<compile_context>
chip_gen: v5e
topology: v5e:2x2
jax: 0.10.0
libtpu: 0.0.40
codegen_flags: <defaults>
</compile_context>

<pallas_src>
import functools
import math

import jax
import jax.numpy as jnp
from jax.experimental import pallas as pl
from jax.experimental.pallas import tpu as pltpu

MXU_DTYPE = jnp.bfloat16     # MXU operand dtype; accumulation stays f32
MASK_VALUE = -1e30           # finite "-inf" for ragged-KV masking (avoids inf-inf NaNs)


# --------------------------- tiled matmul (linear) ---------------------------

def _matmul_kernel(x_ref, w_ref, o_ref, acc_ref):
    @pl.when(pl.program_id(2) == 0)
    def _init():
        acc_ref[...] = jnp.zeros_like(acc_ref)

    # bf16 operands into the MXU, f32 VMEM accumulator.
    acc_ref[...] += jnp.dot(x_ref[...].astype(MXU_DTYPE),
                            w_ref[...].astype(MXU_DTYPE),
                            preferred_element_type=jnp.float32)

    @pl.when(pl.program_id(2) == pl.num_programs(2) - 1)
    def _store():
        o_ref[...] = acc_ref[...].astype(o_ref.dtype)


def linear(x2d, w_t, *, tm=512, tn=256, tk=256):
    """x2d: (M, K) @ w_t: (K, N) -> (M, N). Tiled + software-pipelined on all axes.

    Larger tm reduces weight re-fetches (W tile is read M/tm times)."""
    M, K = x2d.shape
    K2, N = w_t.shape
    assert K == K2
    tm, tn, tk = min(tm, M), min(tn, N), min(tk, K)
    # TODO(synk): pad ragged edges instead of requiring exact divisibility.
    assert M % tm == 0 and N % tn == 0 and K % tk == 0
    return pl.pallas_call(
        _matmul_kernel,
        out_shape=jax.ShapeDtypeStruct((M, N), x2d.dtype),
        grid=(M // tm, N // tn, K // tk),
        in_specs=[
            pl.BlockSpec((tm, tk), lambda i, j, k: (i, k)),
            pl.BlockSpec((tk, tn), lambda i, j, k: (k, j)),
        ],
        out_specs=pl.BlockSpec((tm, tn), lambda i, j, k: (i, j)),
        scratch_shapes=[pltpu.VMEM((tm, tn), jnp.float32)],
        compiler_params=pltpu.CompilerParams(
            dimension_semantics=("parallel", "parallel", "arbitrary")),
    )(x2d, w_t)


# ------------------------- in-place KV-cache update --------------------------

def _cache_update_kernel(new_ref, cache_hbm_ref, out_ref):
    del cache_hbm_ref  # aliased with the output; untouched rows stay in place
    out_ref[...] = new_ref[...]


def update_cache(cache, new, start_pos):
    """Write `new` (B, S, Hkv, d) into `cache` rows [start_pos, start_pos+S) in place.

    input_output_aliases means only the new rows travel through HBM.  The grid is
    coarsened to the largest chunk keeping start_pos block-aligned, so a prefill
    writes whole slabs instead of one row per grid step."""
    B, S, Hkv, d = new.shape
    s_chunk = math.gcd(start_pos, S)            # gcd(0, S) == S -> a single chunk
    while s_chunk > 512 and s_chunk % 2 == 0:   # bound the per-step VMEM block
        s_chunk //= 2
    # TODO(synk): scalar-prefetch start_pos to avoid per-step recompiles in decode.
    return pl.pallas_call(
        _cache_update_kernel,
        out_shape=jax.ShapeDtypeStruct(cache.shape, cache.dtype),
        grid=(B, S // s_chunk),
        in_specs=[
            pl.BlockSpec((1, s_chunk, Hkv, d), lambda b, s: (b, s, 0, 0)),
            pl.BlockSpec(memory_space=pl.ANY),   # raw HBM ref, aliased with output
        ],
        out_specs=pl.BlockSpec((1, s_chunk, Hkv, d),
                               lambda b, s: (b, start_pos // s_chunk + s, 0, 0)),
        input_output_aliases={1: 0},
        compiler_params=pltpu.CompilerParams(
            dimension_semantics=("parallel", "arbitrary")),
    )(new, cache)


# --------------------- flash attention (online softmax) ----------------------

def _flash_attn_kernel(kv_len_ref, q_ref, k_ref, v_ref, o_ref,
                       q_sc, m_sc, l_sc, acc_sc,
                       *, n_kv_heads, n_rep, head_dim):
    t = pl.program_id(2)
    d = head_dim
    sq = q_ref.shape[1]          # query tile length
    tb = k_ref.shape[1]          # KV tile length

    @pl.when(t == 0)
    def _init():
        m_sc[...] = jnp.full_like(m_sc, -jnp.inf)
        l_sc[...] = jnp.zeros_like(l_sc)
        acc_sc[...] = jnp.zeros_like(acc_sc)
        # Stage the query tile ONCE per (batch, q-block): a GQA group's heads are
        # stacked along sublanes so each group needs a single MXU call per KV step
        # (also does the bf16 cast once; the 1/sqrt(d) scale is folded into wq).
        for g in range(n_kv_heads):
            for r in range(n_rep):
                h = g * n_rep + r
                q_sc[g, r * sq:(r + 1) * sq, :] = (
                    q_ref[0, :, h * d:(h + 1) * d].astype(q_sc.dtype))

    # Ragged-tail masking against the scalar-prefetched valid KV length.
    kv_len = kv_len_ref[0]
    col_ids = jax.lax.broadcasted_iota(jnp.int32, (1, tb), 1) + t * tb
    valid = col_ids < kv_len

    for g in range(n_kv_heads):
        # Static ref slices — only one KV group is live at a time.
        k_g = k_ref[0, :, g * d:(g + 1) * d].astype(MXU_DTYPE)    # (tb, d)
        v_g = v_ref[0, :, g * d:(g + 1) * d].astype(MXU_DTYPE)    # (tb, d)
        q_g = q_sc[g]                                             # (n_rep*sq, d) bf16

        # q @ k^T without an explicit transpose; bf16 MXU operands, f32 accumulate.
        s = jax.lax.dot_general(q_g, k_g, (((1,), (1,)), ((), ())),
                                preferred_element_type=jnp.float32)  # (n_rep*sq, tb)
        s = jnp.where(valid, s, MASK_VALUE)

        m_prev = m_sc[g]
        m_new = jnp.maximum(m_prev, jnp.max(s, axis=-1, keepdims=True))
        alpha = jnp.exp(m_prev - m_new)
        # TODO(synk): on v6e/v7x compute exp / p in bf16 (bf16 EUP); keep f32 on v5e.
        p = jnp.exp(s - m_new)
        l_sc[g] = alpha * l_sc[g] + jnp.sum(p, axis=-1, keepdims=True)
        acc_sc[g] = alpha * acc_sc[g] + jnp.dot(
            p.astype(MXU_DTYPE), v_g, preferred_element_type=jnp.float32)
        m_sc[g] = m_new

    @pl.when(t == pl.num_programs(2) - 1)
    def _finalize():
        for g in range(n_kv_heads):
            out_g = acc_sc[g] / l_sc[g]          # exact divide; once per q-tile only
            for r in range(n_rep):
                h = g * n_rep + r
                o_ref[0, :, h * d:(h + 1) * d] = (
                    out_g[r * sq:(r + 1) * sq, :].astype(o_ref.dtype))


def flash_attention(q, keys_cache, values_cache, kv_len, *, n_heads, n_kv_heads,
                    head_dim, kv_len_static, q_block=256, t_block=512):
    """q: (B, S, Hq*d); caches: (maxB, maxT, Hkv*d) -> (B, S, Hq*d).

    Grid = (batch, query blocks, KV blocks).  Attends over the cache in place
    (no [:B, :T] prefix copy); the valid KV length is scalar-prefetched and the
    ragged last KV block is masked in-kernel.  VMEM use is O(sq*Hq*d + tb*Hkv*d)
    regardless of S / T, and the query-block axis is a parallel dim for megacore."""
    B, S, NQ = q.shape
    maxB, maxT, NKV = keys_cache.shape
    n_rep = n_heads // n_kv_heads
    sq = min(q_block, S)
    tb = min(t_block, maxT)
    # TODO(synk): pad instead of asserting for arbitrary S / cache lengths.
    assert S % sq == 0 and maxT % tb == 0
    kv_blocks = pl.cdiv(kv_len_static, tb)

    kern = functools.partial(_flash_attn_kernel, n_kv_heads=n_kv_heads,
                             n_rep=n_rep, head_dim=head_dim)
    grid_spec = pltpu.PrefetchScalarGridSpec(
        num_scalar_prefetch=1,
        grid=(B, S // sq, kv_blocks),
        in_specs=[
            pl.BlockSpec((1, sq, NQ), lambda b, i, t, kv_len: (b, i, 0)),
            pl.BlockSpec((1, tb, NKV), lambda b, i, t, kv_len: (b, t, 0)),
            pl.BlockSpec((1, tb, NKV), lambda b, i, t, kv_len: (b, t, 0)),
        ],
        out_specs=pl.BlockSpec((1, sq, NQ), lambda b, i, t, kv_len: (b, i, 0)),
        scratch_shapes=[
            pltpu.VMEM((n_kv_heads, n_rep * sq, head_dim), MXU_DTYPE),    # staged Q
            pltpu.VMEM((n_kv_heads, n_rep * sq, 1), jnp.float32),         # running max
            pltpu.VMEM((n_kv_heads, n_rep * sq, 1), jnp.float32),         # running sum
            pltpu.VMEM((n_kv_heads, n_rep * sq, head_dim), jnp.float32),  # accumulator
        ],
    )
    return pl.pallas_call(
        kern,
        out_shape=jax.ShapeDtypeStruct((B, S, NQ), q.dtype),
        grid_spec=grid_spec,
        compiler_params=pltpu.CompilerParams(
            dimension_semantics=("parallel", "parallel", "arbitrary"),
            # Sized for v7x's 64 MiB physical VMEM (headroom kept); v5e/v6e have 128 MiB.
            vmem_limit_bytes=48 * 1024 * 1024),
    )(kv_len, q, keys_cache, values_cache)


# ------------------------------- JAX glue ------------------------------------

def apply_rotary(x, freqs_cos, freqs_sin):
    """x: (B, S, H, D); freqs: (S, D//2). Matches torch view_as_complex/view_as_real."""
    # TODO(synk): fuse this interleaved rotary into the QKV matmul finalize
    # (pltpu.roll pair-swizzle on the resident VMEM tile) to keep it off the HBM path.
    xr = x[..., 0::2]
    xi = x[..., 1::2]
    fc = freqs_cos[None, :, None, :]
    fs = freqs_sin[None, :, None, :]
    out_r = xr * fc - xi * fs
    out_i = xr * fs + xi * fc
    return jnp.stack([out_r, out_i], axis=-1).reshape(x.shape).astype(x.dtype)


def prepare_params(params, head_dim):
    """One-time parameter prep (kept OUT of the jitted forward): transpose + fuse the
    QKV weights and fold the 1/sqrt(head_dim) softmax scale into wq so the flash
    kernel never rescales Q per KV step."""
    scale = 1.0 / math.sqrt(head_dim)
    w_qkv = jnp.concatenate(
        [params["wq"].T * scale, params["wk"].T, params["wv"].T], axis=1)
    return {"w_qkv": w_qkv, "wo_t": params["wo"].T}


def repeat_kv(x, n_rep):
    if n_rep == 1:
        return x
    b, t, h, d = x.shape
    return jnp.broadcast_to(x[:, :, :, None, :], (b, t, h, n_rep, d)).reshape(
        b, t, h * n_rep, d)


def self_attention_forward(prep, cache_k, cache_v, x, freqs_cos, freqs_sin, *,
                           start_pos, n_heads, n_kv_heads, head_dim):
    B, S, dim = x.shape
    M = B * S
    Nq = n_heads * head_dim
    Nkv = n_kv_heads * head_dim
    maxB, maxT = cache_k.shape[0], cache_k.shape[1]

    # Fused QKV projection: one tiled matmul over the pre-fused weight
    # (x read from HBM once; scale already folded into the wq columns).
    qkv = linear(x.reshape(M, dim), prep["w_qkv"])
    xq = qkv[:, :Nq].reshape(B, S, n_heads, head_dim)
    xk = qkv[:, Nq:Nq + Nkv].reshape(B, S, n_kv_heads, head_dim)
    xv = qkv[:, Nq + Nkv:].reshape(B, S, n_kv_heads, head_dim)

    # NOTE: the reference rotates Q and V (not K); reproduce that exactly.
    xq = apply_rotary(xq, freqs_cos, freqs_sin)
    xv = apply_rotary(xv, freqs_cos, freqs_sin)

    # In-place (aliased) writeback of just the new tokens into the KV cache.
    cache_k = update_cache(cache_k, xk, start_pos)
    cache_v = update_cache(cache_v, xv, start_pos)

    # Attend over the cache directly: contiguous reshape (free), NO [:B, :T] copy;
    # the valid KV length is scalar-prefetched and the ragged tail masked in-kernel.
    T = start_pos + S
    kv_len = jnp.full((1,), T, dtype=jnp.int32)
    attn = flash_attention(
        xq.reshape(B, S, Nq),
        cache_k.reshape(maxB, maxT, Nkv),
        cache_v.reshape(maxB, maxT, Nkv),
        kv_len, n_heads=n_heads, n_kv_heads=n_kv_heads, head_dim=head_dim,
        kv_len_static=T)                                      # (B, S, Nq)

    out = linear(attn.reshape(M, Nq), prep["wo_t"]).reshape(B, S, dim)
    return out, cache_k, cache_v


# ------------------------- pure-JAX reference check --------------------------

def self_attention_ref(params, cache_k, cache_v, x, start_pos,
                       freqs_cos, freqs_sin, n_heads, n_kv_heads, head_dim):
    B, S, dim = x.shape
    n_rep = n_heads // n_kv_heads
    xq = (x @ params["wq"].T).reshape(B, S, n_heads, head_dim)
    xk = (x @ params["wk"].T).reshape(B, S, n_kv_heads, head_dim)
    xv = (x @ params["wv"].T).reshape(B, S, n_kv_heads, head_dim)
    xq = apply_rotary(xq, freqs_cos, freqs_sin)
    xv = apply_rotary(xv, freqs_cos, freqs_sin)
    cache_k = jax.lax.dynamic_update_slice(cache_k, xk, (0, start_pos, 0, 0))
    cache_v = jax.lax.dynamic_update_slice(cache_v, xv, (0, start_pos, 0, 0))
    keys = repeat_kv(cache_k[:B, : start_pos + S], n_rep)
    values = repeat_kv(cache_v[:B, : start_pos + S], n_rep)
    q = jnp.transpose(xq, (0, 2, 1, 3))
    k = jnp.transpose(keys, (0, 2, 1, 3))
    v = jnp.transpose(values, (0, 2, 1, 3))
    scores = jnp.einsum("bhsd,bhtd->bhst", q, k / math.sqrt(head_dim))
    scores = jax.nn.softmax(scores.astype(jnp.float32), axis=-1).astype(q.dtype)
    out = jnp.einsum("bhst,bhtd->bhsd", scores, v)
    out = jnp.transpose(out, (0, 2, 1, 3)).reshape(B, S, dim)
    return out @ params["wo"].T, cache_k, cache_v


# ---------------------------------- main --------------------------------------

def precompute_freqs(head_dim, seq_len, start_pos=0, theta=10000.0):
    inv = 1.0 / (theta ** (jnp.arange(0, head_dim, 2, dtype=jnp.float32) / head_dim))
    t = jnp.arange(start_pos, start_pos + seq_len, dtype=jnp.float32)
    ang = jnp.outer(t, inv)  # (S, head_dim // 2)
    return jnp.cos(ang), jnp.sin(ang)


if __name__ == "__main__":
    # Small ModelArgs-consistent config.
    dim, n_heads, n_kv_heads = 32, 4, 2
    head_dim = dim // n_heads                 # 8
    B, S = 2, 8
    max_batch, max_seq = 4, 16
    start_pos = 0

    key = jax.random.PRNGKey(0)
    kx, kq, kk, kv, ko = jax.random.split(key, 5)
    x = jax.random.normal(kx, (B, S, dim), dtype=jnp.float32)
    params = {
        # torch nn.Linear stores weight as (out_features, in_features)
        "wq": 0.05 * jax.random.normal(kq, (n_heads * head_dim, dim), jnp.float32),
        "wk": 0.05 * jax.random.normal(kk, (n_kv_heads * head_dim, dim), jnp.float32),
        "wv": 0.05 * jax.random.normal(kv, (n_kv_heads * head_dim, dim), jnp.float32),
        "wo": 0.05 * jax.random.normal(ko, (dim, n_heads * head_dim), jnp.float32),
    }
    cache_k = jnp.zeros((max_batch, max_seq, n_kv_heads, head_dim), jnp.float32)
    cache_v = jnp.zeros((max_batch, max_seq, n_kv_heads, head_dim), jnp.float32)
    freqs_cos, freqs_sin = precompute_freqs(head_dim, S, start_pos)

    # One-time parameter prep (transpose + QKV fuse + fold 1/sqrt(d)) outside jit.
    prep = prepare_params(params, head_dim)

    fwd = jax.jit(functools.partial(
        self_attention_forward, start_pos=start_pos, n_heads=n_heads,
        n_kv_heads=n_kv_heads, head_dim=head_dim))
    out, new_ck, new_cv = fwd(prep, cache_k, cache_v, x, freqs_cos, freqs_sin)
    out = jax.block_until_ready(out)
    new_ck = jax.block_until_ready(new_ck)
    new_cv = jax.block_until_ready(new_cv)

    ref_out, ref_ck, ref_cv = self_attention_ref(
        params, cache_k, cache_v, x, start_pos, freqs_cos, freqs_sin,
        n_heads, n_kv_heads, head_dim)
    ref_out = jax.block_until_ready(ref_out)

    assert out.shape == (B, S, dim)
    # bf16 MXU operands (f32 accumulation) vs. the pure-f32 reference -> relaxed tols.
    assert jnp.allclose(new_ck, ref_ck, rtol=1e-2, atol=1e-2), "cache_k mismatch"
    assert jnp.allclose(new_cv, ref_cv, rtol=1e-2, atol=1e-2), "cache_v mismatch"
    assert jnp.allclose(out, ref_out, rtol=2e-2, atol=2e-2), "mismatch vs reference"
    print("KERNEL_OK")
</pallas_src>

<mosaic_0001>
module attributes {stable_mosaic.version = 11 : i64} {
  func.func @_matmul_kernel(%arg0: i32, %arg1: i32, %arg2: i32, %arg3: memref<16x32xf32, #tpu.memory_space<vmem>>, %arg4: memref<32x64xf32, #tpu.memory_space<vmem>>, %arg5: memref<16x64xf32, #tpu.memory_space<vmem>>, %arg6: memref<16x64xf32, #tpu.memory_space<vmem>>) attributes {dimension_semantics = [#tpu.dimension_semantics<parallel>, #tpu.dimension_semantics<parallel>, #tpu.dimension_semantics<arbitrary>], iteration_bounds = array<i64: 1, 1, 1>, scalar_prefetch = 0 : i64, scratch_operands = 1 : i64, tpu.core_type = #tpu.core_type<tc>, window_params = [{transform_indices = @transform_0, window_bounds = array<i64: 16, 32>}, {transform_indices = @transform_1, window_bounds = array<i64: 32, 64>}, {transform_indices = @transform_2, window_bounds = array<i64: 16, 64>}]} {
    %c0_i32 = arith.constant 0 : i32
    %0 = arith.cmpi eq, %arg2, %c0_i32 : i32
    %1 = arith.extui %0 : i1 to i32
    %c0_i32_0 = arith.constant 0 : i32
    %2 = arith.cmpi ne, %1, %c0_i32_0 : i32
    scf.if %2 {
      %cst_10 = arith.constant 0.000000e+00 : f32
      %14 = vector.broadcast %cst_10 : f32 to vector<16x64xf32>
      %c0_11 = arith.constant 0 : index
      %c0_12 = arith.constant 0 : index
      %15 = vector.load %arg6[%c0_11, %c0_12] : memref<16x64xf32, #tpu.memory_space<vmem>>, vector<16x64xf32>
      tpu.vector_store %arg6[%c0_11, %c0_12], %14 {strides = array<i32>} : memref<16x64xf32, #tpu.memory_space<vmem>>, vector<16x64xf32>,
    } else {
    }
    %c0 = arith.constant 0 : index
    %c0_1 = arith.constant 0 : index
    %3 = vector.load %arg6[%c0, %c0_1] : memref<16x64xf32, #tpu.memory_space<vmem>>, vector<16x64xf32>
    %c0_2 = arith.constant 0 : index
    %c0_3 = arith.constant 0 : index
    %4 = vector.load %arg3[%c0_2, %c0_3] : memref<16x32xf32, #tpu.memory_space<vmem>>, vector<16x32xf32>
    %5 = arith.truncf %4 : vector<16x32xf32> to vector<16x32xbf16>
    %c0_4 = arith.constant 0 : index
    %c0_5 = arith.constant 0 : index
    %6 = vector.load %arg4[%c0_4, %c0_5] : memref<32x64xf32, #tpu.memory_space<vmem>>, vector<32x64xf32>
    %7 = arith.truncf %6 : vector<32x64xf32> to vector<32x64xbf16>
    %cst = arith.constant dense<0.000000e+00> : vector<16x64xf32>
    %8 = tpu.matmul %5, %7, %cst {dimension_numbers = #tpu.dot_dimension_numbers<[1], [0], [0], [1], [0, 0, 1, 1], [], []>} : vector<16x32xbf16>, vector<32x64xbf16>, vector<16x64xf32> -> vector<16x64xf32>
    %9 = arith.addf %3, %8 : vector<16x64xf32>
    %c0_6 = arith.constant 0 : index
    %c0_7 = arith.constant 0 : index
    %10 = vector.load %arg6[%c0_6, %c0_7] : memref<16x64xf32, #tpu.memory_space<vmem>>, vector<16x64xf32>
    tpu.vector_store %arg6[%c0_6, %c0_7], %9 {strides = array<i32>} : memref<16x64xf32, #tpu.memory_space<vmem>>, vector<16x64xf32>,
    %c0_i32_8 = arith.constant 0 : i32
    %11 = arith.cmpi eq, %arg2, %c0_i32_8 : i32
    %12 = arith.extui %11 : i1 to i32
    %c0_i32_9 = arith.constant 0 : i32
    %13 = arith.cmpi ne, %12, %c0_i32_9 : i32
    scf.if %13 {
      %c0_10 = arith.constant 0 : index
      %c0_11 = arith.constant 0 : index
      %14 = vector.load %arg6[%c0_10, %c0_11] : memref<16x64xf32, #tpu.memory_space<vmem>>, vector<16x64xf32>
      %c0_12 = arith.constant 0 : index
      %c0_13 = arith.constant 0 : index
      %15 = vector.load %arg5[%c0_12, %c0_13] : memref<16x64xf32, #tpu.memory_space<vmem>>, vector<16x64xf32>
      tpu.vector_store %arg5[%c0_12, %c0_13], %14 {strides = array<i32>} : memref<16x64xf32, #tpu.memory_space<vmem>>, vector<16x64xf32>,
    } else {
    }
    return
  }
  func.func @transform_0(%arg0: i32, %arg1: i32, %arg2: i32) -> (i32, i32) {
    %c0_i32 = arith.constant 0 : i32
    return %arg0, %arg2 : i32, i32
  }
  func.func @transform_1(%arg0: i32, %arg1: i32, %arg2: i32) -> (i32, i32) {
    %c0_i32 = arith.constant 0 : i32
    return %arg2, %arg1 : i32, i32
  }
  func.func @transform_2(%arg0: i32, %arg1: i32, %arg2: i32) -> (i32, i32) {
    %c0_i32 = arith.constant 0 : i32
    return %arg0, %arg1 : i32, i32
  }
}

module attributes {stable_mosaic.version = 11 : i64} {
  func.func @_cache_update_kernel(%arg0: i32, %arg1: i32, %arg2: memref<1x8x2x8xf32, #tpu.memory_space<vmem>>, %arg3: memref<4x16x2x8xf32, #tpu.memory_space<any>>, %arg4: memref<1x8x2x8xf32, #tpu.memory_space<vmem>>) attributes {dimension_semantics = [#tpu.dimension_semantics<parallel>, #tpu.dimension_semantics<arbitrary>], iteration_bounds = array<i64: 2, 1>, scalar_prefetch = 0 : i64, scratch_operands = 0 : i64, tpu.core_type = #tpu.core_type<tc>, window_params = [{transform_indices = @transform_0, window_bounds = array<i64: 1, 8, 2, 8>}, {}, {transform_indices = @transform_2, window_bounds = array<i64: 1, 8, 2, 8>}]} {
    %c0 = arith.constant 0 : index
    %c0_0 = arith.constant 0 : index
    %c0_1 = arith.constant 0 : index
    %c0_2 = arith.constant 0 : index
    %0 = vector.load %arg2[%c0, %c0_0, %c0_1, %c0_2] : memref<1x8x2x8xf32, #tpu.memory_space<vmem>>, vector<1x8x2x8xf32>
    %c0_3 = arith.constant 0 : index
    %c0_4 = arith.constant 0 : index
    %c0_5 = arith.constant 0 : index
    %c0_6 = arith.constant 0 : index
    %1 = vector.load %arg4[%c0_3, %c0_4, %c0_5, %c0_6] : memref<1x8x2x8xf32, #tpu.memory_space<vmem>>, vector<1x8x2x8xf32>
    tpu.vector_store %arg4[%c0_3, %c0_4, %c0_5, %c0_6], %0 {strides = array<i32>} : memref<1x8x2x8xf32, #tpu.memory_space<vmem>>, vector<1x8x2x8xf32>,
    return
  }
  func.func @transform_0(%arg0: i32, %arg1: i32) -> (i32, i32, i32, i32) {
    %c0_i32 = arith.constant 0 : i32
    %c0_i32_0 = arith.constant 0 : i32
    %c0_i32_1 = arith.constant 0 : i32
    return %arg0, %arg1, %c0_i32, %c0_i32_0 : i32, i32, i32, i32
  }
  func.func @transform_2(%arg0: i32, %arg1: i32) -> (i32, i32, i32, i32) {
    %c0_i32 = arith.constant 0 : i32
    %0 = arith.addi %c0_i32, %arg1 : i32
    %c0_i32_0 = arith.constant 0 : i32
    %c0_i32_1 = arith.constant 0 : i32
    %c0_i32_2 = arith.constant 0 : i32
    return %arg0, %0, %c0_i32_0, %c0_i32_1 : i32, i32, i32, i32
  }
}

module attributes {stable_mosaic.version = 11 : i64} {
  func.func @_matmul_kernel(%arg0: i32, %arg1: i32, %arg2: i32, %arg3: memref<16x32xf32, #tpu.memory_space<vmem>>, %arg4: memref<32x32xf32, #tpu.memory_space<vmem>>, %arg5: memref<16x32xf32, #tpu.memory_space<vmem>>, %arg6: memref<16x32xf32, #tpu.memory_space<vmem>>) attributes {dimension_semantics = [#tpu.dimension_semantics<parallel>, #tpu.dimension_semantics<parallel>, #tpu.dimension_semantics<arbitrary>], iteration_bounds = array<i64: 1, 1, 1>, scalar_prefetch = 0 : i64, scratch_operands = 1 : i64, tpu.core_type = #tpu.core_type<tc>, window_params = [{transform_indices = @transform_0, window_bounds = array<i64: 16, 32>}, {transform_indices = @transform_1, window_bounds = array<i64: 32, 32>}, {transform_indices = @transform_2, window_bounds = array<i64: 16, 32>}]} {
    %c0_i32 = arith.constant 0 : i32
    %0 = arith.cmpi eq, %arg2, %c0_i32 : i32
    %1 = arith.extui %0 : i1 to i32
    %c0_i32_0 = arith.constant 0 : i32
    %2 = arith.cmpi ne, %1, %c0_i32_0 : i32
    scf.if %2 {
      %cst_10 = arith.constant 0.000000e+00 : f32
      %14 = vector.broadcast %cst_10 : f32 to vector<16x32xf32>
      %c0_11 = arith.constant 0 : index
      %c0_12 = arith.constant 0 : index
      %15 = vector.load %arg6[%c0_11, %c0_12] : memref<16x32xf32, #tpu.memory_space<vmem>>, vector<16x32xf32>
      tpu.vector_store %arg6[%c0_11, %c0_12], %14 {strides = array<i32>} : memref<16x32xf32, #tpu.memory_space<vmem>>, vector<16x32xf32>,
    } else {
    }
    %c0 = arith.constant 0 : index
    %c0_1 = arith.constant 0 : index
    %3 = vector.load %arg6[%c0, %c0_1] : memref<16x32xf32, #tpu.memory_space<vmem>>, vector<16x32xf32>
    %c0_2 = arith.constant 0 : index
    %c0_3 = arith.constant 0 : index
    %4 = vector.load %arg3[%c0_2, %c0_3] : memref<16x32xf32, #tpu.memory_space<vmem>>, vector<16x32xf32>
    %5 = arith.truncf %4 : vector<16x32xf32> to vector<16x32xbf16>
    %c0_4 = arith.constant 0 : index
    %c0_5 = arith.constant 0 : index
    %6 = vector.load %arg4[%c0_4, %c0_5] : memref<32x32xf32, #tpu.memory_space<vmem>>, vector<32x32xf32>
    %7 = arith.truncf %6 : vector<32x32xf32> to vector<32x32xbf16>
    %cst = arith.constant dense<0.000000e+00> : vector<16x32xf32>
    %8 = tpu.matmul %5, %7, %cst {dimension_numbers = #tpu.dot_dimension_numbers<[1], [0], [0], [1], [0, 0, 1, 1], [], []>} : vector<16x32xbf16>, vector<32x32xbf16>, vector<16x32xf32> -> vector<16x32xf32>
    %9 = arith.addf %3, %8 : vector<16x32xf32>
    %c0_6 = arith.constant 0 : index
    %c0_7 = arith.constant 0 : index
    %10 = vector.load %arg6[%c0_6, %c0_7] : memref<16x32xf32, #tpu.memory_space<vmem>>, vector<16x32xf32>
    tpu.vector_store %arg6[%c0_6, %c0_7], %9 {strides = array<i32>} : memref<16x32xf32, #tpu.memory_space<vmem>>, vector<16x32xf32>,
    %c0_i32_8 = arith.constant 0 : i32
    %11 = arith.cmpi eq, %arg2, %c0_i32_8 : i32
    %12 = arith.extui %11 : i1 to i32
    %c0_i32_9 = arith.constant 0 : i32
    %13 = arith.cmpi ne, %12, %c0_i32_9 : i32
    scf.if %13 {
      %c0_10 = arith.constant 0 : index
      %c0_11 = arith.constant 0 : index
      %14 = vector.load %arg6[%c0_10, %c0_11] : memref<16x32xf32, #tpu.memory_space<vmem>>, vector<16x32xf32>
      %c0_12 = arith.constant 0 : index
      %c0_13 = arith.constant 0 : index
      %15 = vector.load %arg5[%c0_12, %c0_13] : memref<16x32xf32, #tpu.memory_space<vmem>>, vector<16x32xf32>
      tpu.vector_store %arg5[%c0_12, %c0_13], %14 {strides = array<i32>} : memref<16x32xf32, #tpu.memory_space<vmem>>, vector<16x32xf32>,
    } else {
    }
    return
  }
  func.func @transform_0(%arg0: i32, %arg1: i32, %arg2: i32) -> (i32, i32) {
    %c0_i32 = arith.constant 0 : i32
    return %arg0, %arg2 : i32, i32
  }
  func.func @transform_1(%arg0: i32, %arg1: i32, %arg2: i32) -> (i32, i32) {
    %c0_i32 = arith.constant 0 : i32
    return %arg2, %arg1 : i32, i32
  }
  func.func @transform_2(%arg0: i32, %arg1: i32, %arg2: i32) -> (i32, i32) {
    %c0_i32 = arith.constant 0 : i32
    return %arg0, %arg1 : i32, i32
  }
}

module attributes {stable_mosaic.version = 11 : i64} {
  func.func @_flash_attn_kernel(%arg0: i32, %arg1: i32, %arg2: i32, %arg3: memref<1xi32, #tpu.memory_space<smem>>, %arg4: memref<1x8x32xf32, #tpu.memory_space<vmem>>, %arg5: memref<1x16x16xf32, #tpu.memory_space<vmem>>, %arg6: memref<1x16x16xf32, #tpu.memory_space<vmem>>, %arg7: memref<1x8x32xf32, #tpu.memory_space<vmem>>, %arg8: memref<2x16x8xbf16, #tpu.memory_space<vmem>>, %arg9: memref<2x16x1xf32, #tpu.memory_space<vmem>>, %arg10: memref<2x16x1xf32, #tpu.memory_space<vmem>>, %arg11: memref<2x16x8xf32, #tpu.memory_space<vmem>>) attributes {dimension_semantics = [#tpu.dimension_semantics<parallel>, #tpu.dimension_semantics<parallel>, #tpu.dimension_semantics<arbitrary>], iteration_bounds = array<i64: 2, 1, 1>, scalar_prefetch = 1 : i64, scratch_operands = 4 : i64, tpu.core_type = #tpu.core_type<tc>, window_params = [{transform_indices = @transform_0, window_bounds = array<i64: 1, 8, 32>}, {transform_indices = @transform_1, window_bounds = array<i64: 1, 16, 16>}, {transform_indices = @transform_2, window_bounds = array<i64: 1, 16, 16>}, {transform_indices = @transform_3, window_bounds = array<i64: 1, 8, 32>}]} {
    %c0_i32 = arith.constant 0 : i32
    %0 = arith.cmpi eq, %arg2, %c0_i32 : i32
    %1 = arith.extui %0 : i1 to i32
    %c0_i32_0 = arith.constant 0 : i32
    %2 = arith.cmpi ne, %1, %c0_i32_0 : i32
    scf.if %2 {
      %cst_64 = arith.constant 0xFF800000 : f32
      %103 = vector.broadcast %cst_64 : f32 to vector<2x16x1xf32>
      %c0_65 = arith.constant 0 : index
      %c0_66 = arith.constant 0 : index
      %c0_67 = arith.constant 0 : index
      %104 = vector.load %arg9[%c0_65, %c0_66, %c0_67] : memref<2x16x1xf32, #tpu.memory_space<vmem>>, vector<2x16x1xf32>
      tpu.vector_store %arg9[%c0_65, %c0_66, %c0_67], %103 {strides = array<i32>} : memref<2x16x1xf32, #tpu.memory_space<vmem>>, vector<2x16x1xf32>,
      %cst_68 = arith.constant 0.000000e+00 : f32
      %105 = vector.broadcast %cst_68 : f32 to vector<2x16x1xf32>
      %c0_69 = arith.constant 0 : index
      %c0_70 = arith.constant 0 : index
      %c0_71 = arith.constant 0 : index
      %106 = vector.load %arg10[%c0_69, %c0_70, %c0_71] : memref<2x16x1xf32, #tpu.memory_space<vmem>>, vector<2x16x1xf32>
      tpu.vector_store %arg10[%c0_69, %c0_70, %c0_71], %105 {strides = array<i32>} : memref<2x16x1xf32, #tpu.memory_space<vmem>>, vector<2x16x1xf32>,
      %cst_72 = arith.constant 0.000000e+00 : f32
      %107 = vector.broadcast %cst_72 : f32 to vector<2x16x8xf32>
      %c0_73 = arith.constant 0 : index
      %c0_74 = arith.constant 0 : index
      %c0_75 = arith.constant 0 : index
      %108 = vector.load %arg11[%c0_73, %c0_74, %c0_75] : memref<2x16x8xf32, #tpu.memory_space<vmem>>, vector<2x16x8xf32>
      tpu.vector_store %arg11[%c0_73, %c0_74, %c0_75], %107 {strides = array<i32>} : memref<2x16x8xf32, #tpu.memory_space<vmem>>, vector<2x16x8xf32>,
      %c0_76 = arith.constant 0 : index
      %c0_77 = arith.constant 0 : index
      %c0_78 = arith.constant 0 : index
      %109 = vector.load %arg4[%c0_76, %c0_77, %c0_78] : memref<1x8x32xf32, #tpu.memory_space<vmem>>, vector<1x8x8xf32>
      %110 = vector.shape_cast %109 : vector<1x8x8xf32> to vector<8x8xf32>
      %111 = arith.truncf %110 : vector<8x8xf32> to vector<8x8xbf16>
      %c0_79 = arith.constant 0 : index
      %c0_80 = arith.constant 0 : index
      %c0_81 = arith.constant 0 : index
      %112 = vector.load %arg8[%c0_79, %c0_80, %c0_81] : memref<2x16x8xbf16, #tpu.memory_space<vmem>>, vector<1x8x8xbf16>
      %113 = vector.shape_cast %112 : vector<1x8x8xbf16> to vector<8x8xbf16>
      %114 = vector.shape_cast %111 : vector<8x8xbf16> to vector<1x8x8xbf16>
      tpu.vector_store %arg8[%c0_79, %c0_80, %c0_81], %114 {strides = array<i32>} : memref<2x16x8xbf16, #tpu.memory_space<vmem>>, vector<1x8x8xbf16>,
      %c0_82 = arith.constant 0 : index
      %c0_83 = arith.constant 0 : index
      %c8_84 = arith.constant 8 : index
      %115 = vector.load %arg4[%c0_82, %c0_83, %c8_84] : memref<1x8x32xf32, #tpu.memory_space<vmem>>, vector<1x8x8xf32>
      %116 = vector.shape_cast %115 : vector<1x8x8xf32> to vector<8x8xf32>
      %117 = arith.truncf %116 : vector<8x8xf32> to vector<8x8xbf16>
      %c0_85 = arith.constant 0 : index
      %c8_86 = arith.constant 8 : index
      %c0_87 = arith.constant 0 : index
      %118 = vector.load %arg8[%c0_85, %c8_86, %c0_87] : memref<2x16x8xbf16, #tpu.memory_space<vmem>>, vector<1x8x8xbf16>
      %119 = vector.shape_cast %118 : vector<1x8x8xbf16> to vector<8x8xbf16>
      %120 = vector.shape_cast %117 : vector<8x8xbf16> to vector<1x8x8xbf16>
      tpu.vector_store %arg8[%c0_85, %c8_86, %c0_87], %120 {strides = array<i32>} : memref<2x16x8xbf16, #tpu.memory_space<vmem>>, vector<1x8x8xbf16>,
      %c0_88 = arith.constant 0 : index
      %c0_89 = arith.constant 0 : index
      %c16 = arith.constant 16 : index
      %121 = vector.load %arg4[%c0_88, %c0_89, %c16] : memref<1x8x32xf32, #tpu.memory_space<vmem>>, vector<1x8x8xf32>
      %122 = vector.shape_cast %121 : vector<1x8x8xf32> to vector<8x8xf32>
      %123 = arith.truncf %122 : vector<8x8xf32> to vector<8x8xbf16>
      %c1_90 = arith.constant 1 : index
      %c0_91 = arith.constant 0 : index
      %c0_92 = arith.constant 0 : index
      %124 = vector.load %arg8[%c1_90, %c0_91, %c0_92] : memref<2x16x8xbf16, #tpu.memory_space<vmem>>, vector<1x8x8xbf16>
      %125 = vector.shape_cast %124 : vector<1x8x8xbf16> to vector<8x8xbf16>
      %126 = vector.shape_cast %123 : vector<8x8xbf16> to vector<1x8x8xbf16>
      tpu.vector_store %arg8[%c1_90, %c0_91, %c0_92], %126 {strides = array<i32>} : memref<2x16x8xbf16, #tpu.memory_space<vmem>>, vector<1x8x8xbf16>,
      %c0_93 = arith.constant 0 : index
      %c0_94 = arith.constant 0 : index
      %c24 = arith.constant 24 : index
      %127 = vector.load %arg4[%c0_93, %c0_94, %c24] : memref<1x8x32xf32, #tpu.memory_space<vmem>>, vector<1x8x8xf32>
      %128 = vector.shape_cast %127 : vector<1x8x8xf32> to vector<8x8xf32>
      %129 = arith.truncf %128 : vector<8x8xf32> to vector<8x8xbf16>
      %c1_95 = arith.constant 1 : index
      %c8_96 = arith.constant 8 : index
      %c0_97 = arith.constant 0 : index
      %130 = vector.load %arg8[%c1_95, %c8_96, %c0_97] : memref<2x16x8xbf16, #tpu.memory_space<vmem>>, vector<1x8x8xbf16>
      %131 = vector.shape_cast %130 : vector<1x8x8xbf16> to vector<8x8xbf16>
      %132 = vector.shape_cast %129 : vector<8x8xbf16> to vector<1x8x8xbf16>
      tpu.vector_store %arg8[%c1_95, %c8_96, %c0_97], %132 {strides = array<i32>} : memref<2x16x8xbf16, #tpu.memory_space<vmem>>, vector<1x8x8xbf16>,
    } else {
    }
    %c0 = arith.constant 0 : index
    %3 = memref.load %arg3[%c0] : memref<1xi32, #tpu.memory_space<smem>>
    %4 = tpu.iota {dimensions = array<i32: 1>} : vector<1x16xi32>
    %c16_i32 = arith.constant 16 : i32
    %5 = arith.muli %arg2, %c16_i32 : i32
    %6 = vector.broadcast %5 : i32 to vector<1x16xi32>
    %7 = arith.addi %4, %6 : vector<1x16xi32>
    %8 = vector.broadcast %3 : i32 to vector<1x16xi32>
    %9 = arith.cmpi slt, %7, %8 : vector<1x16xi32>
    %c0_1 = arith.constant 0 : index
    %c0_2 = arith.constant 0 : index
    %c0_3 = arith.constant 0 : index
    %10 = vector.load %arg5[%c0_1, %c0_2, %c0_3] : memref<1x16x16xf32, #tpu.memory_space<vmem>>, vector<1x16x8xf32>
    %11 = vector.shape_cast %10 : vector<1x16x8xf32> to vector<16x8xf32>
    %12 = arith.truncf %11 : vector<16x8xf32> to vector<16x8xbf16>
    %c0_4 = arith.constant 0 : index
    %c0_5 = arith.constant 0 : index
    %c0_6 = arith.constant 0 : index
    %13 = vector.load %arg6[%c0_4, %c0_5, %c0_6] : memref<1x16x16xf32, #tpu.memory_space<vmem>>, vector<1x16x8xf32>
    %14 = vector.shape_cast %13 : vector<1x16x8xf32> to vector<16x8xf32>
    %15 = arith.truncf %14 : vector<16x8xf32> to vector<16x8xbf16>
    %c0_7 = arith.constant 0 : index
    %c0_8 = arith.constant 0 : index
    %c0_9 = arith.constant 0 : index
    %16 = vector.load %arg8[%c0_7, %c0_8, %c0_9] : memref<2x16x8xbf16, #tpu.memory_space<vmem>>, vector<1x16x8xbf16>
    %17 = vector.shape_cast %16 : vector<1x16x8xbf16> to vector<16x8xbf16>
    %cst = arith.constant dense<0.000000e+00> : vector<16x16xf32>
    %18 = tpu.matmul %17, %12, %cst {dimension_numbers = #tpu.dot_dimension_numbers<[1], [1], [0], [0], [0, 0, 1, 0], [], []>} : vector<16x8xbf16>, vector<16x8xbf16>, vector<16x16xf32> -> vector<16x16xf32>
    %cst_10 = arith.constant -1.000000e+30 : f32
    %19 = vector.shape_cast %9 : vector<1x16xi1> to vector<1x16xi1>
    %20 = vector.broadcast %19 : vector<1x16xi1> to vector<16x16xi1>
    %21 = vector.broadcast %cst_10 : f32 to vector<16x16xf32>
    %22 = arith.select %20, %18, %21 : vector<16x16xi1>, vector<16x16xf32>
    %c0_11 = arith.constant 0 : index
    %c0_12 = arith.constant 0 : index
    %c0_13 = arith.constant 0 : index
    %23 = vector.load %arg9[%c0_11, %c0_12, %c0_13] : memref<2x16x1xf32, #tpu.memory_space<vmem>>, vector<1x16x1xf32>
    %24 = vector.shape_cast %23 : vector<1x16x1xf32> to vector<16x1xf32>
    %cst_14 = arith.constant dense<0xFF800000> : vector<16xf32>
    %25 = vector.multi_reduction <maximumf>, %22, %cst_14 [1] : vector<16x16xf32> to vector<16xf32>
    %26 = vector.shape_cast %25 : vector<16xf32> to vector<16x1xf32>
    %27 = arith.maximumf %24, %26 : vector<16x1xf32>
    %28 = arith.subf %24, %27 : vector<16x1xf32>
    %29 = math.exp %28 : vector<16x1xf32>
    %30 = vector.broadcast %27 : vector<16x1xf32> to vector<16x16xf32>
    %31 = arith.subf %22, %30 : vector<16x16xf32>
    %32 = math.exp %31 : vector<16x16xf32>
    %c0_15 = arith.constant 0 : index
    %c0_16 = arith.constant 0 : index
    %c0_17 = arith.constant 0 : index
    %33 = vector.load %arg10[%c0_15, %c0_16, %c0_17] : memref<2x16x1xf32, #tpu.memory_space<vmem>>, vector<1x16x1xf32>
    %34 = vector.shape_cast %33 : vector<1x16x1xf32> to vector<16x1xf32>
    %35 = arith.mulf %29, %34 : vector<16x1xf32>
    %cst_18 = arith.constant dense<0.000000e+00> : vector<16xf32>
    %36 = vector.multi_reduction <add>, %32, %cst_18 [1] : vector<16x16xf32> to vector<16xf32>
    %37 = vector.shape_cast %36 : vector<16xf32> to vector<16x1xf32>
    %38 = arith.addf %35, %37 : vector<16x1xf32>
    %c0_19 = arith.constant 0 : index
    %c0_20 = arith.constant 0 : index
    %c0_21 = arith.constant 0 : index
    %39 = vector.load %arg10[%c0_19, %c0_20, %c0_21] : memref<2x16x1xf32, #tpu.memory_space<vmem>>, vector<1x16x1xf32>
    %40 = vector.shape_cast %39 : vector<1x16x1xf32> to vector<16x1xf32>
    %41 = vector.shape_cast %38 : vector<16x1xf32> to vector<1x16x1xf32>
    tpu.vector_store %arg10[%c0_19, %c0_20, %c0_21], %41 {strides = array<i32>} : memref<2x16x1xf32, #tpu.memory_space<vmem>>, vector<1x16x1xf32>,
    %c0_22 = arith.constant 0 : index
    %c0_23 = arith.constant 0 : index
    %c0_24 = arith.constant 0 : index
    %42 = vector.load %arg11[%c0_22, %c0_23, %c0_24] : memref<2x16x8xf32, #tpu.memory_space<vmem>>, vector<1x16x8xf32>
    %43 = vector.shape_cast %42 : vector<1x16x8xf32> to vector<16x8xf32>
    %44 = vector.broadcast %29 : vector<16x1xf32> to vector<16x8xf32>
    %45 = arith.mulf %44, %43 : vector<16x8xf32>
    %46 = arith.truncf %32 : vector<16x16xf32> to vector<16x16xbf16>
    %cst_25 = arith.constant dense<0.000000e+00> : vector<16x8xf32>
    %47 = tpu.matmul %46, %15, %cst_25 {dimension_numbers = #tpu.dot_dimension_numbers<[1], [0], [0], [1], [0, 0, 1, 1], [], []>} : vector<16x16xbf16>, vector<16x8xbf16>, vector<16x8xf32> -> vector<16x8xf32>
    %48 = arith.addf %45, %47 : vector<16x8xf32>
    %c0_26 = arith.constant 0 : index
    %c0_27 = arith.constant 0 : index
    %c0_28 = arith.constant 0 : index
    %49 = vector.load %arg11[%c0_26, %c0_27, %c0_28] : memref<2x16x8xf32, #tpu.memory_space<vmem>>, vector<1x16x8xf32>
    %50 = vector.shape_cast %49 : vector<1x16x8xf32> to vector<16x8xf32>
    %51 = vector.shape_cast %48 : vector<16x8xf32> to vector<1x16x8xf32>
    tpu.vector_store %arg11[%c0_26, %c0_27, %c0_28], %51 {strides = array<i32>} : memref<2x16x8xf32, #tpu.memory_space<vmem>>, vector<1x16x8xf32>,
    %c0_29 = arith.constant 0 : index
    %c0_30 = arith.constant 0 : index
    %c0_31 = arith.constant 0 : index
    %52 = vector.load %arg9[%c0_29, %c0_30, %c0_31] : memref<2x16x1xf32, #tpu.memory_space<vmem>>, vector<1x16x1xf32>
    %53 = vector.shape_cast %52 : vector<1x16x1xf32> to vector<16x1xf32>
    %54 = vector.shape_cast %27 : vector<16x1xf32> to vector<1x16x1xf32>
    tpu.vector_store %arg9[%c0_29, %c0_30, %c0_31], %54 {strides = array<i32>} : memref<2x16x1xf32, #tpu.memory_space<vmem>>, vector<1x16x1xf32>,
    %c0_32 = arith.constant 0 : index
    %c0_33 = arith.constant 0 : index
    %c8 = arith.constant 8 : index
    %55 = vector.load %arg5[%c0_32, %c0_33, %c8] : memref<1x16x16xf32, #tpu.memory_space<vmem>>, vector<1x16x8xf32>
    %56 = vector.shape_cast %55 : vector<1x16x8xf32> to vector<16x8xf32>
    %57 = arith.truncf %56 : vector<16x8xf32> to vector<16x8xbf16>
    %c0_34 = arith.constant 0 : index
    %c0_35 = arith.constant 0 : index
    %c8_36 = arith.constant 8 : index
    %58 = vector.load %arg6[%c0_34, %c0_35, %c8_36] : memref<1x16x16xf32, #tpu.memory_space<vmem>>, vector<1x16x8xf32>
    %59 = vector.shape_cast %58 : vector<1x16x8xf32> to vector<16x8xf32>
    %60 = arith.truncf %59 : vector<16x8xf32> to vector<16x8xbf16>
    %c1 = arith.constant 1 : index
    %c0_37 = arith.constant 0 : index
    %c0_38 = arith.constant 0 : index
    %61 = vector.load %arg8[%c1, %c0_37, %c0_38] : memref<2x16x8xbf16, #tpu.memory_space<vmem>>, vector<1x16x8xbf16>
    %62 = vector.shape_cast %61 : vector<1x16x8xbf16> to vector<16x8xbf16>
    %cst_39 = arith.constant dense<0.000000e+00> : vector<16x16xf32>
    %63 = tpu.matmul %62, %57, %cst_39 {dimension_numbers = #tpu.dot_dimension_numbers<[1], [1], [0], [0], [0, 0, 1, 0], [], []>} : vector<16x8xbf16>, vector<16x8xbf16>, vector<16x16xf32> -> vector<16x16xf32>
    %cst_40 = arith.constant -1.000000e+30 : f32
    %64 = vector.shape_cast %9 : vector<1x16xi1> to vector<1x16xi1>
    %65 = vector.broadcast %64 : vector<1x16xi1> to vector<16x16xi1>
    %66 = vector.broadcast %cst_40 : f32 to vector<16x16xf32>
    %67 = arith.select %65, %63, %66 : vector<16x16xi1>, vector<16x16xf32>
    %c1_41 = arith.constant 1 : index
    %c0_42 = arith.constant 0 : index
    %c0_43 = arith.constant 0 : index
    %68 = vector.load %arg9[%c1_41, %c0_42, %c0_43] : memref<2x16x1xf32, #tpu.memory_space<vmem>>, vector<1x16x1xf32>
    %69 = vector.shape_cast %68 : vector<1x16x1xf32> to vector<16x1xf32>
    %cst_44 = arith.constant dense<0xFF800000> : vector<16xf32>
    %70 = vector.multi_reduction <maximumf>, %67, %cst_44 [1] : vector<16x16xf32> to vector<16xf32>
    %71 = vector.shape_cast %70 : vector<16xf32> to vector<16x1xf32>
    %72 = arith.maximumf %69, %71 : vector<16x1xf32>
    %73 = arith.subf %69, %72 : vector<16x1xf32>
    %74 = math.exp %73 : vector<16x1xf32>
    %75 = vector.broadcast %72 : vector<16x1xf32> to vector<16x16xf32>
    %76 = arith.subf %67, %75 : vector<16x16xf32>
    %77 = math.exp %76 : vector<16x16xf32>
    %c1_45 = arith.constant 1 : index
    %c0_46 = arith.constant 0 : index
    %c0_47 = arith.constant 0 : index
    %78 = vector.load %arg10[%c1_45, %c0_46, %c0_47] : memref<2x16x1xf32, #tpu.memory_space<vmem>>, vector<1x16x1xf32>
    %79 = vector.shape_cast %78 : vector<1x16x1xf32> to vector<16x1xf32>
    %80 = arith.mulf %74, %79 : vector<16x1xf32>
    %cst_48 = arith.constant dense<0.000000e+00> : vector<16xf32>
    %81 = vector.multi_reduction <add>, %77, %cst_48 [1] : vector<16x16xf32> to vector<16xf32>
    %82 = vector.shape_cast %81 : vector<16xf32> to vector<16x1xf32>
    %83 = arith.addf %80, %82 : vector<16x1xf32>
    %c1_49 = arith.constant 1 : index
    %c0_50 = arith.constant 0 : index
    %c0_51 = arith.constant 0 : index
    %84 = vector.load %arg10[%c1_49, %c0_50, %c0_51] : memref<2x16x1xf32, #tpu.memory_space<vmem>>, vector<1x16x1xf32>
    %85 = vector.shape_cast %84 : vector<1x16x1xf32> to vector<16x1xf32>
    %86 = vector.shape_cast %83 : vector<16x1xf32> to vector<1x16x1xf32>
    tpu.vector_store %arg10[%c1_49, %c0_50, %c0_51], %86 {strides = array<i32>} : memref<2x16x1xf32, #tpu.memory_space<vmem>>, vector<1x16x1xf32>,
    %c1_52 = arith.constant 1 : index
    %c0_53 = arith.constant 0 : index
    %c0_54 = arith.constant 0 : index
    %87 = vector.load %arg11[%c1_52, %c0_53, %c0_54] : memref<2x16x8xf32, #tpu.memory_space<vmem>>, vector<1x16x8xf32>
    %88 = vector.shape_cast %87 : vector<1x16x8xf32> to vector<16x8xf32>
    %89 = vector.broadcast %74 : vector<16x1xf32> to vector<16x8xf32>
    %90 = arith.mulf %89, %88 : vector<16x8xf32>
    %91 = arith.truncf %77 : vector<16x16xf32> to vector<16x16xbf16>
    %cst_55 = arith.constant dense<0.000000e+00> : vector<16x8xf32>
    %92 = tpu.matmul %91, %60, %cst_55 {dimension_numbers = #tpu.dot_dimension_numbers<[1], [0], [0], [1], [0, 0, 1, 1], [], []>} : vector<16x16xbf16>, vector<16x8xbf16>, vector<16x8xf32> -> vector<16x8xf32>
    %93 = arith.addf %90, %92 : vector<16x8xf32>
    %c1_56 = arith.constant 1 : index
    %c0_57 = arith.constant 0 : index
    %c0_58 = arith.constant 0 : index
    %94 = vector.load %arg11[%c1_56, %c0_57, %c0_58] : memref<2x16x8xf32, #tpu.memory_space<vmem>>, vector<1x16x8xf32>
    %95 = vector.shape_cast %94 : vector<1x16x8xf32> to vector<16x8xf32>
    %96 = vector.shape_cast %93 : vector<16x8xf32> to vector<1x16x8xf32>
    tpu.vector_store %arg11[%c1_56, %c0_57, %c0_58], %96 {strides = array<i32>} : memref<2x16x8xf32, #tpu.memory_space<vmem>>, vector<1x16x8xf32>,
    %c1_59 = arith.constant 1 : index
    %c0_60 = arith.constant 0 : index
    %c0_61 = arith.constant 0 : index
    %97 = vector.load %arg9[%c1_59, %c0_60, %c0_61] : memref<2x16x1xf32, #tpu.memory_space<vmem>>, vector<1x16x1xf32>
    %98 = vector.shape_cast %97 : vector<1x16x1xf32> to vector<16x1xf32>
    %99 = vector.shape_cast %72 : vector<16x1xf32> to vector<1x16x1xf32>
    tpu.vector_store %arg9[%c1_59, %c0_60, %c0_61], %99 {strides = array<i32>} : memref<2x16x1xf32, #tpu.memory_space<vmem>>, vector<1x16x1xf32>,
    %c0_i32_62 = arith.constant 0 : i32
    %100 = arith.cmpi eq, %arg2, %c0_i32_62 : i32
    %101 = arith.extui %100 : i1 to i32
    %c0_i32_63 = arith.constant 0 : i32
    %102 = arith.cmpi ne, %101, %c0_i32_63 : i32
    scf.if %102 {
      %c0_64 = arith.constant 0 : index
      %c0_65 = arith.constant 0 : index
      %c0_66 = arith.constant 0 : index
      %103 = vector.load %arg11[%c0_64, %c0_65, %c0_66] : memref<2x16x8xf32, #tpu.memory_space<vmem>>, vector<1x16x8xf32>
      %104 = vector.shape_cast %103 : vector<1x16x8xf32> to vector<16x8xf32>
      %c0_67 = arith.constant 0 : index
      %c0_68 = arith.constant 0 : index
      %c0_69 = arith.constant 0 : index
      %105 = vector.load %arg10[%c0_67, %c0_68, %c0_69] : memref<2x16x1xf32, #tpu.memory_space<vmem>>, vector<1x16x1xf32>
      %106 = vector.shape_cast %105 : vector<1x16x1xf32> to vector<16x1xf32>
      %107 = vector.broadcast %106 : vector<16x1xf32> to vector<16x8xf32>
      %108 = arith.divf %104, %107 : vector<16x8xf32>
      %109 = vector.extract_strided_slice %108 {offsets = [0, 0], sizes = [8, 8], strides = [1, 1]} : vector<16x8xf32> to vector<8x8xf32>
      %c0_70 = arith.constant 0 : index
      %c0_71 = arith.constant 0 : index
      %c0_72 = arith.constant 0 : index
      %110 = vector.load %arg7[%c0_70, %c0_71, %c0_72] : memref<1x8x32xf32, #tpu.memory_space<vmem>>, vector<1x8x8xf32>
      %111 = vector.shape_cast %110 : vector<1x8x8xf32> to vector<8x8xf32>
      %112 = vector.shape_cast %109 : vector<8x8xf32> to vector<1x8x8xf32>
      tpu.vector_store %arg7[%c0_70, %c0_71, %c0_72], %112 {strides = array<i32>} : memref<1x8x32xf32, #tpu.memory_space<vmem>>, vector<1x8x8xf32>,
      %113 = vector.extract_strided_slice %108 {offsets = [8, 0], sizes = [8, 8], strides = [1, 1]} : vector<16x8xf32> to vector<8x8xf32>
      %c0_73 = arith.constant 0 : index
      %c0_74 = arith.constant 0 : index
      %c8_75 = arith.constant 8 : index
      %114 = vector.load %arg7[%c0_73, %c0_74, %c8_75] : memref<1x8x32xf32, #tpu.memory_space<vmem>>, vector<1x8x8xf32>
      %115 = vector.shape_cast %114 : vector<1x8x8xf32> to vector<8x8xf32>
      %116 = vector.shape_cast %113 : vector<8x8xf32> to vector<1x8x8xf32>
      tpu.vector_store %arg7[%c0_73, %c0_74, %c8_75], %116 {strides = array<i32>} : memref<1x8x32xf32, #tpu.memory_space<vmem>>, vector<1x8x8xf32>,
      %c1_76 = arith.constant 1 : index
      %c0_77 = arith.constant 0 : index
      %c0_78 = arith.constant 0 : index
      %117 = vector.load %arg11[%c1_76, %c0_77, %c0_78] : memref<2x16x8xf32, #tpu.memory_space<vmem>>, vector<1x16x8xf32>
      %118 = vector.shape_cast %117 : vector<1x16x8xf32> to vector<16x8xf32>
      %c1_79 = arith.constant 1 : index
      %c0_80 = arith.constant 0 : index
      %c0_81 = arith.constant 0 : index
      %119 = vector.load %arg10[%c1_79, %c0_80, %c0_81] : memref<2x16x1xf32, #tpu.memory_space<vmem>>, vector<1x16x1xf32>
      %120 = vector.shape_cast %119 : vector<1x16x1xf32> to vector<16x1xf32>
      %121 = vector.broadcast %120 : vector<16x1xf32> to vector<16x8xf32>
      %122 = arith.divf %118, %121 : vector<16x8xf32>
      %123 = vector.extract_strided_slice %122 {offsets = [0, 0], sizes = [8, 8], strides = [1, 1]} : vector<16x8xf32> to vector<8x8xf32>
      %c0_82 = arith.constant 0 : index
      %c0_83 = arith.constant 0 : index
      %c16 = arith.constant 16 : index
      %124 = vector.load %arg7[%c0_82, %c0_83, %c16] : memref<1x8x32xf32, #tpu.memory_space<vmem>>, vector<1x8x8xf32>
      %125 = vector.shape_cast %124 : vector<1x8x8xf32> to vector<8x8xf32>
      %126 = vector.shape_cast %123 : vector<8x8xf32> to vector<1x8x8xf32>
      tpu.vector_store %arg7[%c0_82, %c0_83, %c16], %126 {strides = array<i32>} : memref<1x8x32xf32, #tpu.memory_space<vmem>>, vector<1x8x8xf32>,
      %127 = vector.extract_strided_slice %122 {offsets = [8, 0], sizes = [8, 8], strides = [1, 1]} : vector<16x8xf32> to vector<8x8xf32>
      %c0_84 = arith.constant 0 : index
      %c0_85 = arith.constant 0 : index
      %c24 = arith.constant 24 : index
      %128 = vector.load %arg7[%c0_84, %c0_85, %c24] : memref<1x8x32xf32, #tpu.memory_space<vmem>>, vector<1x8x8xf32>
      %129 = vector.shape_cast %128 : vector<1x8x8xf32> to vector<8x8xf32>
      %130 = vector.shape_cast %127 : vector<8x8xf32> to vector<1x8x8xf32>
      tpu.vector_store %arg7[%c0_84, %c0_85, %c24], %130 {strides = array<i32>} : memref<1x8x32xf32, #tpu.memory_space<vmem>>, vector<1x8x8xf32>,
    } else {
    }
    return
  }
  func.func @transform_0(%arg0: i32, %arg1: i32, %arg2: i32, %arg3: memref<1xi32, #tpu.memory_space<smem>>) -> (i32, i32, i32) {
    %c0_i32 = arith.constant 0 : i32
    %c0_i32_0 = arith.constant 0 : i32
    return %arg0, %arg1, %c0_i32 : i32, i32, i32
  }
  func.func @transform_1(%arg0: i32, %arg1: i32, %arg2: i32, %arg3: memref<1xi32, #tpu.memory_space<smem>>) -> (i32, i32, i32) {
    %c0_i32 = arith.constant 0 : i32
    %c0_i32_0 = arith.constant 0 : i32
    return %arg0, %arg2, %c0_i32 : i32, i32, i32
  }
  func.func @transform_2(%arg0: i32, %arg1: i32, %arg2: i32, %arg3: memref<1xi32, #tpu.memory_space<smem>>) -> (i32, i32, i32) {
    %c0_i32 = arith.constant 0 : i32
    %c0_i32_0 = arith.constant 0 : i32
    return %arg0, %arg2, %c0_i32 : i32, i32, i32
  }
  func.func @transform_3(%arg0: i32, %arg1: i32, %arg2: i32, %arg3: memref<1xi32, #tpu.memory_space<smem>>) -> (i32, i32, i32) {
    %c0_i32 = arith.constant 0 : i32
    %c0_i32_0 = arith.constant 0 : i32
    return %arg0, %arg1, %c0_i32 : i32, i32, i32
  }
}

</mosaic_0001>

<bundles_post_ra>
// kernel: self_attention_forward.5
= control target key start
LH: loop header
LB: loop body
LE: loop exit
PB: predicated region body
PF: predicated region fallthrough
CT: control target
= control target key end

     0   :  { %7 = vsyncpa [#allocation4], 0  ;;  %s194_s0 = inlined_call_operand.hbm [shape: f32[16,32], index: 0, kind: input, shape index: {}]   ;;  %s195_s1 = inlined_call_operand.hbm [shape: f32[32,64], index: 1, kind: input, shape index: {}]   ;;  %s196_s2 = inlined_call_operand.vmem [shape: f32[16,64], index: 2, kind: output, shape index: {}]  }
   0x1   :  { %s13_s11 = sshll.u32 %s194_s0, 4  ;;  %s14_s11 = int_to_ptr.hbm [resolvable:$true] %s13_s11 }
   0x2   :  { %8 = vsyncpa [#allocation6], 0  ;;  %s156_s12 = smov [#allocation3]   ;;  %s26_s16 = sshll.u32 %s195_s1, 4  ;;  %s27_s16 = int_to_ptr.hbm [resolvable:$true] %s26_s16 }
   0x3   :  { %s15_s13 = sshll.u32 %s156_s12, 4  ;;  %s157_s17 = smov 128   ;;  %s16_s13 = int_to_ptr.vmem [resolvable:$true] %s15_s13 }
   0x4   :  { %s158_s18 = smov 8   ;;  %s159_s19 = smov [#allocation5]  }
   0x5   :  { %21 = dma.hbm_to_vmem [thread:$0]  %s14_s11, 256, %s16_s13, [#allocation4], %s157_s17, %s157_s17, %s158_s18  }
   0x6   :  { %s28_s20 = sshll.u32 %s159_s19, 4  ;;  %s29_s20 = int_to_ptr.vmem [resolvable:$true] %s28_s20 }
   0x7   :  { %34 = dma.hbm_to_vmem [thread:$0]  %s27_s16, 512, %s29_s20, [#allocation6], %s157_s17, %s157_s17, %s158_s18  }
   0x8   :  { %152 = dma.done.wait [#allocation4], 256  }
   0x9   :  { %153 = vsyncadd [#allocation4], 4294967040 }
   0xa   :  { %154 = dma.done.wait [#allocation6], 512  }
   0xb   :  { %155 = vsyncadd [#allocation6], 4294966784  ;;  %vm48_vm0 = vcmask 523264   ;;  %v160_v0 = vmov 0.0   ;;  %v58_v1 = vld [vmem:[#allocation5 + $0x10] sm:$0xff]  ;;  %v59_v2 = vld [vmem:[#allocation5 + $0x18] sm:$0xff] }
   0xc   :  { %49 = vst.msk [vmem:[#allocation2] sm:$0xff] %vm48_vm0, %v160_v0  ;;  %v56_v3 = vld [vmem:[#allocation5] sm:$0xff]  ;;  %v61_v4 = vpack.c.bf16 %v59_v2, %v58_v1  ;;  %v57_v5 = vld [vmem:[#allocation5 + $0x8] sm:$0xff]  ;;  %v53_v7 = vld [vmem:[#allocation3] sm:$0xff]  ;;  %vm62_vm1 = vcmask 261120  }
   0xd   :  { %50 = vst.msk [vmem:[#allocation2 + $0x8] sm:$0xff] %vm48_vm0, %v160_v0  ;;  %v60_v6 = vpack.c.bf16 %v57_v5, %v56_v3  ;;  %v54_v8 = vld [vmem:[#allocation3 + $0x8] sm:$0xff] }
   0xe   :  { %72 = vmatpush.bf16.msra.mxu0 %v61_v4  ;;  %v55_v9 = vpack.c.bf16 %v54_v8, %v53_v7 }
  0x12   :  { %73 = vmatpush.bf16.msra.mxu0 %v60_v6 }
  0x13   :  { %v51_v10 = vld [vmem:[#allocation2] sm:$0xff] }
  0x14   :  { %v52_v13 = vld [vmem:[#allocation2 + $0x8] sm:$0xff] }
  0x15   :  { %98 = vmatmul.msk.bf16.vlgmr.msra.gmra.mxu0 %vm62_vm1, %v55_v9 }
  0x92   :  { %v75_v11 = vpop.f32.mrf.mxu0 }
  0x93   :  { %v80_v12 = vadd.f32 %v75_v11, %v51_v10 }
  0x95   :  { %83 = vst.msk [vmem:[#allocation2] sm:$0xff] %vm48_vm0, %v80_v12 }
  0x9a   :  { %v77_v14 = vpop.f32.mrf.mxu0 }
  0x9b   :  { %v81_v15 = vadd.f32 %v77_v14, %v52_v13 }
  0x9c   :  { %v88_v16 = vld [vmem:[#allocation2] sm:$0xff] }
  0x9d   :  { %90 = vst.msk [vmem:[%s196_s2] sm:$0xff] %vm48_vm0, %v88_v16 }
  0x9e   :  { %84 = vst.msk [vmem:[#allocation2 + $0x8] sm:$0xff] %vm48_vm0, %v81_v15 }
  0xa5   :  { %v89_v17 = vld [vmem:[#allocation2 + $0x8] sm:$0xff] }
  0xa6   :  { %91 = vst.msk [vmem:[%s196_s2 + $0x8] sm:$0xff] %vm48_vm0, %v89_v17 }
  0xa7   :  { %96 = vsyncpa [#allocation4], 1 }
  0xa8   :  { %97 = vsyncpa [#allocation6], 1 }

// kernel: self_attention_forward.6
= control target key start
LH: loop header
LB: loop body
LE: loop exit
PB: predicated region body
PF: predicated region fallthrough
CT: control target
= control target key end

     0   :  { %s337_s9 = smov 0   ;;  %s339_s10 = smov 0   ;;  %s378_s0 = inlined_call_operand.vmem [shape: f32[2,8,2,8], index: 0, kind: input, shape index: {}]   ;;  %s379_s1 = inlined_call_operand.vmem [shape: f32[4,16,2,8], index: 1, kind: input, shape index: {}, may-alias: {1,2}]   ;;  %s380_s2 = inlined_call_operand.vmem [shape: f32[4,16,2,8], index: 2, kind: output, shape index: {}, may-alias: {1,2}]  }
   0x1   :  { %s341_s11 = smov 0  }
   0x2 LB: > { %s24_s1 = sadd.s32 1, %s316_s10  ;;  %p265_p0 = scmp.ge.s32.totalorder %s320_s11, 1  ;;  %s320_s11 = sphi %s341_s11, %s12_s11   ;;  %s316_s10 = sphi %s339_s10, %s382_s10   ;;  %s312_s9 = sphi %s337_s9, %s381_s9  }
   0x3   : > { %p26_p1 = scmp.ge.s32.totalorder %s24_s1, 2  ;;  %p109_p2 = scmp.lt.s32.totalorder %s320_s11, 3 }
   0x5   : > { %s384_s1 = smov (%p26_p1, %s24_s1), 0  ;;  %p110_p3 = pnand %p265_p0, %p109_p2 }
   0x6   : > { %p138_p4 = scmp.lt.s32.totalorder (!%p110_p3), %s312_s9, 1  ;;  %p148_p5 = scmp.lt.s32.totalorder (!%p110_p3), %s312_s9, 3 }
   0x7   : > { %113 = sbr.rel (%p110_p3) target bundleno = 25 (0x19), region = 24 }
   0xc   : > { %s139_s12 = scalar_select %p138_p4, %s312_s9, 1  ;;  %vm165_vm0 = vcmask 58368  }
   0xd   : > { %s386_s9 = smov (!%p148_p5, %s312_s9), 3 }
   0xe   : > { %s272_s13 = sshll.u32 %s139_s12, 4  ;;  %s273_s17 = sshll.u32 %s386_s9, 5 }
   0xf   : > { %s145_s16 = scalar_lea.vmem %s378_s0, %s272_s13  ;;  %s155_s20 = scalar_lea.vmem %s380_s2, %s273_s17 }
  0x10   : > { %v157_v0 = vld [vmem:[%s145_s16] sm:$0x3]  ;;  %v158_v1 = vld [vmem:[%s145_s16 + $0x2] sm:$0x3]  ;;  %v159_v2 = vld [vmem:[%s145_s16 + $0x4] sm:$0x3] }
  0x11   : > { %166 = vst.msk [vmem:[%s155_s20] sm:$0x3] %vm165_vm0, %v157_v0  ;;  %v160_v3 = vld [vmem:[%s145_s16 + $0x6] sm:$0x3]  ;;  %v161_v4 = vld [vmem:[%s145_s16 + $0x8] sm:$0x3] }
  0x12   : > { %167 = vst.msk [vmem:[%s155_s20 + $0x2] sm:$0x3] %vm165_vm0, %v158_v1  ;;  %v162_v5 = vld [vmem:[%s145_s16 + $0xa] sm:$0x3]  ;;  %v163_v6 = vld [vmem:[%s145_s16 + $0xc] sm:$0x3] }
  0x13   : > { %168 = vst.msk [vmem:[%s155_s20 + $0x4] sm:$0x3] %vm165_vm0, %v159_v2  ;;  %v164_v7 = vld [vmem:[%s145_s16 + $0xe] sm:$0x3] }
  0x14   : > { %169 = vst.msk [vmem:[%s155_s20 + $0x6] sm:$0x3] %vm165_vm0, %v160_v3 }
  0x15   : > { %170 = vst.msk [vmem:[%s155_s20 + $0x8] sm:$0x3] %vm165_vm0, %v161_v4 }
  0x16   : > { %171 = vst.msk [vmem:[%s155_s20 + $0xa] sm:$0x3] %vm165_vm0, %v162_v5 }
  0x17   : > { %172 = vst.msk [vmem:[%s155_s20 + $0xc] sm:$0x3] %vm165_vm0, %v163_v6 }
  0x18   : > { %173 = vst.msk [vmem:[%s155_s20 + $0xe] sm:$0x3] %vm165_vm0, %v164_v7 }
  0x19 PF: > { %s12_s11 = sadd.s32 1, %s320_s11   ;;  %s381_s9 = smov %s316_s10 }
  0x1a   : > { %p9_p6 = scmp.ge.s32.totalorder %s12_s11, 4   ;;  %s382_s10 = smov %s384_s1 }
  0x1c   :  { %11 = sbr.rel (!%p9_p6) target bundleno = 2 (0x2), region = 54 }

// kernel: self_attention_forward.9
= control target key start
LH: loop header
LB: loop body
LE: loop exit
PB: predicated region body
PF: predicated region fallthrough
CT: control target
= control target key end

     0   :  { %vm17_vm0 = vcmask 261120   ;;  %v109_v5 = vmov 0.0   ;;  %s156_s0 = inlined_call_operand.vmem [shape: f32[16,32], index: 0, kind: input, shape index: {}]   ;;  %s157_s1 = inlined_call_operand.vmem [shape: f32[32,32], index: 1, kind: input, shape index: {}]   ;;  %s158_s2 = inlined_call_operand.hbm [shape: f32[16,32], index: 2, kind: output, shape index: {}]  }
   0x1   :  { %v27_v0 = vld [vmem:[%s157_s1 + $0x10] sm:$0xff]  ;;  %v28_v1 = vld [vmem:[%s157_s1 + $0x18] sm:$0xff]  ;;  %v25_v2 = vld [vmem:[%s157_s1] sm:$0xff]  ;;  %18 = vst.msk [vmem:[#allocation2] sm:$0xff] %vm17_vm0, %v109_v5 }
   0x2   :  { %v30_v3 = vpack.c.bf16 %v28_v1, %v27_v0  ;;  %v26_v4 = vld [vmem:[%s157_s1 + $0x8] sm:$0xff]  ;;  %19 = vst.msk [vmem:[#allocation2 + $0x8] sm:$0xff] %vm17_vm0, %v109_v5 }
   0x3   :  { %7 = vsyncpa [#allocation4], 0  ;;  %v29_v6 = vpack.c.bf16 %v26_v4, %v25_v2  ;;  %v22_v7 = vld [vmem:[%s156_s0] sm:$0xff]  ;;  %v23_v8 = vld [vmem:[%s156_s0 + $0x8] sm:$0xff]  ;;  %s110_s1 = smov [#allocation3]   ;;  %s66_s23 = sshll.u32 %s158_s2, 4  ;;  %s67_s23 = int_to_ptr.hbm [resolvable:$true] %s66_s23 }
   0x4   :  { %41 = vmatpush.bf16.msra.mxu0 %v30_v3  ;;  %v24_v9 = vpack.c.bf16 %v23_v8, %v22_v7  ;;  %s64_s21 = sshll.u32 %s110_s1, 4  ;;  %s111_s24 = smov 128   ;;  %s65_s21 = int_to_ptr.vmem [resolvable:$true] %s64_s21 }
   0x5   :  { %s112_s25 = smov 8  }
   0x8   :  { %42 = vmatpush.bf16.msra.mxu0 %v29_v6  ;;  %v20_v10 = vld [vmem:[#allocation2] sm:$0xff] }
   0x9   :  { %v21_v13 = vld [vmem:[#allocation2 + $0x8] sm:$0xff] }
   0xb   :  { %78 = vmatmul.msk.bf16.vlgmr.msra.gmra.mxu0 %vm17_vm0, %v24_v9 }
  0x88   :  { %v44_v11 = vpop.f32.mrf.mxu0 }
  0x89   :  { %v49_v12 = vadd.f32 %v44_v11, %v20_v10 }
  0x8b   :  { %51 = vst.msk [vmem:[#allocation2] sm:$0xff] %vm17_vm0, %v49_v12 }
  0x90   :  { %v46_v14 = vpop.f32.mrf.mxu0 }
  0x91   :  { %v50_v15 = vadd.f32 %v46_v14, %v21_v13 }
  0x92   :  { %v56_v16 = vld [vmem:[#allocation2] sm:$0xff] }
  0x93   :  { %52 = vst.msk [vmem:[#allocation2 + $0x8] sm:$0xff] %vm17_vm0, %v50_v15 }
  0x94   :  { %58 = vst.msk [vmem:[#allocation3] sm:$0xff] %vm17_vm0, %v56_v16 }
  0x9a   :  { %v57_v17 = vld [vmem:[#allocation2 + $0x8] sm:$0xff] }
  0x9b   :  { %59 = vst.msk [vmem:[#allocation3 + $0x8] sm:$0xff] %vm17_vm0, %v57_v17 }
  0x9c   :  { %72 = dma.vmem_to_hbm [thread:$0]  %s65_s21, 256, %s67_s23, [#allocation4], %s111_s24, %s111_s24, %s112_s25  }
  0x9d   :  { %107 = dma.done.wait [#allocation4], 256  }
  0x9e   :  { %108 = vsyncadd [#allocation4], 4294967040 }
  0x9f   :  { %77 = vsyncpa [#allocation4], 1 }

// kernel: self_attention_forward.8
= control target key start
LH: loop header
LB: loop body
LE: loop exit
PB: predicated region body
PF: predicated region fallthrough
CT: control target
= control target key end

     0   :  { %s958_s17 = smov 0   ;;  %s960_s18 = smov 0   ;;  %s1077_s0 = inlined_call_operand.<no memory space> [shape: s32[1], index: 0, kind: input, shape index: {}]   ;;  %s1078_s1 = inlined_call_operand.vmem [shape: f32[2,8,32], index: 1, kind: input, shape index: {}]   ;;  %s1079_s2 = inlined_call_operand.vmem [shape: f32[4,16,16], index: 2, kind: input, shape index: {}]   ;;  %s1080_s3 = inlined_call_operand.vmem [shape: f32[4,16,16], index: 3, kind: input, shape index: {}]   ;;  %s1081_s4 = inlined_call_operand.vmem [shape: f32[2,8,32], index: 4, kind: output, shape index: {}]  }
   0x1   :  { %9 = sst [smem:[#allocation7]] %s1077_s0  ;;  %s962_s19 = smov 0  }
   0x2 LB: > { %s34_s0 = sadd.s32 1, %s915_s18  ;;  %p812_p0 = scmp.ge.s32.totalorder %s919_s19, 1  ;;  %s919_s19 = sphi %s962_s19, %s15_s19   ;;  %s915_s18 = sphi %s960_s18, %s1087_s18   ;;  %s911_s17 = sphi %s958_s17, %s1086_s17  }
   0x3   : > { %p36_p1 = scmp.ge.s32.totalorder %s34_s0, 2  ;;  %p198_p2 = scmp.lt.s32.totalorder %s919_s19, 3 }
   0x5   : > { %s1089_s0 = smov (%p36_p1, %s34_s0), 0  ;;  %p199_p3 = pnand %p812_p0, %p198_p2 }
   0x6   : > { %p252_p4 = scmp.lt.s32.totalorder (!%p199_p3), %s911_s17, 3  ;;  %p244_p5 = scmp.lt.s32.totalorder (!%p199_p3), %s911_s17, 1 }
   0x7   : > { %202 = sbr.rel (%p199_p3) target bundleno = 910 (0x38e), region = 32  ;;  %s921_s29 = smov (!%p199_p3), 120  }
   0x8   : > { %s922_s30 = smov (!%p199_p3), 112   ;;  %s923_s5 = smov (!%p199_p3), 104  }
   0x9   : > { %s323_s6 = sld [smem:[#allocation7]] (!%p199_p3)  ;;  %s927_s10 = smov (!%p199_p3), 8  }
   0xa   : > { %s928_s11 = smov (!%p199_p3), 16   ;;  %s929_s12 = smov (!%p199_p3), 24  }
   0xc   : > { %s976_s20 = scalar_select %p252_p4, %s911_s17, 3  ;;  %vm299_vm0 = vcmask 60416   ;;  %vm292_vm1 = vcmask 64512   ;;  %vm283_vm2 = vcmask 7168   ;;  %v924_v13 = vmov -inf  }
   0xd   : > { %s1091_s17 = smov (!%p244_p5, %s911_s17), 1  ;;  %284 = vst.msk [vmem:[#allocation3] sm:$0xff] %vm283_vm2, %v924_v13  ;;  %v324_v14 = vlaneseq  ;;  %vm371_vm4 = vcmask 130048   ;;  %v925_v29 = vmov 0   ;;  %v926_v33 = vmov 0.0  }
   0xe   : > { %s833_s21 = sshll.u32 %s976_s20, 4  ;;  %s813_s25 = sshll.u32 %s1091_s17, 3  ;;  %285 = vst.msk [vmem:[#allocation3 + $0x8] sm:$0xff] %vm283_vm2, %v924_v13  ;;  %870 = vset.pattern.permute.xlu2 %v925_v29  ;;  %871 = vset.pattern.permute.xlu0 %v925_v29 }
   0xf   : > { %s259_s24 = scalar_lea.vmem %s1079_s2, %s833_s21  ;;  %s250_s28 = scalar_lea.vmem %s1078_s1, %s813_s25  ;;  %286 = vst.msk [vmem:[#allocation3 + $0x10] sm:$0xff] %vm283_vm2, %v924_v13  ;;  %v325_v15 = vand.u32 127, %v324_v14  ;;  %v329_v16 = vstv %s323_s6  ;;  %872 = vset.pattern.permute.xlu1 %v925_v29 }
  0x10   : > { %v455_v0 = vld [vmem:[%s259_s24] sm:$0xff]  ;;  %v456_v1 = vld [vmem:[%s259_s24 + $0x8] sm:$0xff]  ;;  %287 = vst.msk [vmem:[#allocation3 + $0x18] sm:$0xff] %vm283_vm2, %v924_v13  ;;  %s269_s9 = scalar_lea.vmem %s1080_s3, %s833_s21  ;;  %s277_s15 = scalar_lea.vmem %s1081_s4, %s813_s25 }
  0x11   : > { %v457_v2 = vpack.c.bf16 %v456_v1, %v455_v0  ;;  %v308_v3 = vld [vmem:[%s250_s28] sm:$0xff]  ;;  %vm330_vm3 = vcmp.lt.s32.totalorder %v325_v15, %v329_v16  ;;  %v459_v31 = vld [vmem:[%s269_s9 + $0x8] sm:$0xff]  ;;  %293 = vst.msk [vmem:[#allocation5] sm:$0xff] %vm292_vm1, %v926_v33 }
  0x12   : > { %v309_v4 = vpack.c.bf16 %v308_v3, %v308_v3  ;;  %v458_v30 = vld [vmem:[%s269_s9] sm:$0xff]  ;;  %288 = vst.msk [vmem:[#allocation4] sm:$0xff] %vm283_vm2, %v926_v33 }
  0x13   : > { %470 = vrot.lane.b32.xlu1 %v457_v2, %s921_s29  ;;  %v349_v5 = vsel %vm292_vm1, %v457_v2, 0  ;;  %v460_v32 = vpack.c.bf16 %v459_v31, %v458_v30  ;;  %289 = vst.msk [vmem:[#allocation4 + $0x8] sm:$0xff] %vm283_vm2, %v926_v33 }
  0x14   : > { %311 = vrot.lane.b32.xlu0 %v309_v4, %s922_s30  ;;  %300 = vst.msk [vmem:[#allocation2] sm:$0xf] %vm299_vm0, %v309_v4  ;;  %358 = vmatpush.bf16.xpose.msra.mxu0 %v349_v5  ;;  %v369_v34 = vld [vmem:[#allocation3] sm:$0xff] }
  0x15   : > { %442 = vmatpush.bf16.msra.mxu1 %v460_v32  ;;  %290 = vst.msk [vmem:[#allocation4 + $0x10] sm:$0xff] %vm283_vm2, %v926_v33  ;;  %v370_v40 = vld [vmem:[#allocation3 + $0x8] sm:$0xff] }
  0x16   : > { %291 = vst.msk [vmem:[#allocation4 + $0x18] sm:$0xff] %vm283_vm2, %v926_v33  ;;  %v495_v39 = vld [vmem:[#allocation3 + $0x10] sm:$0xff] }
  0x17   : > { %294 = vst.msk [vmem:[#allocation5 + $0x8] sm:$0xff] %vm292_vm1, %v926_v33  ;;  %v496_v48 = vld [vmem:[#allocation3 + $0x18] sm:$0xff] }
  0x18   : > { %295 = vst.msk [vmem:[#allocation5 + $0x10] sm:$0xff] %vm292_vm1, %v926_v33 }
  0x19   : > { %296 = vst.msk [vmem:[#allocation5 + $0x18] sm:$0xff] %vm292_vm1, %v926_v33 }
  0x1b   : > { %304 = vrot.lane.b32.xlu1 %v309_v4, %s921_s29 }
  0x1c   : > { %319 = vrot.lane.b32.xlu0 %v309_v4, %s923_s5  ;;  %v528_v15 = vld [vmem:[#allocation4 + $0x10] sm:$0xff] }
  0x85   : > { %v471_v6 = vpop.permute.xlu1 %470 }
  0x86   : > { %v476_v7 = vsel %vm292_vm1, %v471_v6, 0  ;;  %v312_v8 = vpop.permute.xlu0 %311 }
  0x87   : > { %485 = vmatpush.bf16.xpose.msra.mxu2 %v476_v7  ;;  %315 = vst.msk [vmem:[#allocation2 + $0x8] sm:$0xf] %vm299_vm0, %v312_v8 }
  0x8d   : > { %v305_v9 = vpop.permute.xlu1 %304 }
  0x8e   : > { %307 = vst.msk [vmem:[#allocation2 + $0x4] sm:$0xf] %vm299_vm0, %v305_v9  ;;  %v320_v10 = vpop.permute.xlu0 %319 }
  0x8f   : > { %322 = vst.msk [vmem:[#allocation2 + $0xc] sm:$0xf] %vm299_vm0, %v320_v10 }
  0x95   : > { %v835_v11 = vld [vmem:[#allocation2] sm:$0xff] }
  0x96   : > { %823 = vmatmul.msk.bf16.vlgmr.msra.gmra.mxu0 %vm292_vm1, %v835_v11  ;;  %v836_v12 = vld [vmem:[#allocation2 + $0x8] sm:$0xff] }
  0x97   : > { %829 = vmatmul.msk.bf16.vlgmr.msra.gmra.mxu2 %vm292_vm1, %v836_v12 }
 0x113   : > { %v360_v17 = vpop.f32.mrf.mxu0 }
 0x114   : > { %v1002_v18 = vsel %vm330_vm3, %v360_v17, -1e+30 }
 0x115   : > { %v372_v19 = vsel %vm371_vm4, %v1002_v18, -inf }
 0x116   : > { %373 = vmax.xlane.f32.xlu0 %v372_v19 }
 0x11a   : > { %v487_v20 = vpop.f32.mrf.mxu2 }
 0x11b   : > { %v362_v21 = vpop.f32.mrf.mxu0  ;;  %v492_v22 = vsel %vm330_vm3, %v487_v20, -1e+30 }
 0x11c   : > { %v1006_v23 = vsel %vm330_vm3, %v362_v21, -1e+30  ;;  %v497_v24 = vsel %vm371_vm4, %v492_v22, -inf  ;;  %v403_v21 = vld [vmem:[#allocation4 + $0x8] sm:$0xff] }
 0x11d   : > { %v375_v25 = vsel %vm371_vm4, %v1006_v23, -inf  ;;  %498 = vmax.xlane.f32.xlu2 %v497_v24 }
 0x11e   : > { %376 = vmax.xlane.f32.xlu1 %v375_v25 }
 0x122   : > { %v489_v26 = vpop.f32.mrf.mxu2 }
 0x123   : > { %v493_v27 = vsel %vm330_vm3, %v489_v26, -1e+30  ;;  %v529_v26 = vld [vmem:[#allocation4 + $0x18] sm:$0xff] }
 0x124   : > { %v500_v28 = vsel %vm371_vm4, %v493_v27, -inf }
 0x125   : > { %501 = vmax.xlane.f32.xlu2 %v500_v28 }
 0x12a   : > { %559 = vrot.lane.b32.xlu0 %v460_v32, %s921_s29 }
 0x189   : > { %v374_v35 = vpop.xlane.xlu0 %373 }
 0x18a   : > { %v378_v36 = vmax.f32 %v369_v34, %v374_v35 }
 0x18c   : > { %v380_v37 = vsub.f32 %v369_v34, %v378_v36  ;;  %453 = vst.msk [vmem:[#allocation3] sm:$0xff] %vm283_vm2, %v378_v36  ;;  %388 = vperm.xlu2 %870, %v378_v36   ;;  %v402_v36 = vld [vmem:[#allocation4] sm:$0xff] }
 0x18e   : > { %v382_v38 = vmul.f32 1.442695, %v380_v37  ;;  %v418_v37 = vld [vmem:[#allocation5 + $0x8] sm:$0xff] }
 0x190   : > { %873 = vpow2.f32 %v382_v38  ;;  %v499_v41 = vpop.xlane.xlu2 %498 }
 0x191   : > { %v377_v42 = vpop.xlane.xlu1 %376  ;;  %v503_v43 = vmax.f32 %v495_v39, %v499_v41 }
 0x192   : > { %v379_v44 = vmax.f32 %v370_v40, %v377_v42 }
 0x193   : > { %v505_v45 = vsub.f32 %v495_v39, %v503_v43  ;;  %583 = vst.msk [vmem:[#allocation3 + $0x10] sm:$0xff] %vm283_vm2, %v503_v43 }
 0x194   : > { %v381_v46 = vsub.f32 %v370_v40, %v379_v44  ;;  %513 = vperm.xlu2 %870, %v503_v43   ;;  %454 = vst.msk [vmem:[#allocation3 + $0x8] sm:$0xff] %vm283_vm2, %v379_v44 }
 0x195   : > { %v507_v13 = vmul.f32 1.442695, %v505_v45 }
 0x196   : > { %v1029_v47 = vpop.eup %873  ;;  %v384_v6 = vmul.f32 1.442695, %v381_v46 }
 0x197   : > { %421 = vperm.xlu0 %871, %v1029_v47   ;;  %v404_v39 = vmul.f32 %v1029_v47, %v402_v36 }
 0x198   : > { %v502_v49 = vpop.xlane.xlu2 %501 }
 0x199   : > { %v504_v50 = vmax.f32 %v496_v48, %v502_v49 }
 0x19b   : > { %v506_v51 = vsub.f32 %v496_v48, %v504_v50  ;;  %584 = vst.msk [vmem:[#allocation3 + $0x18] sm:$0xff] %vm283_vm2, %v504_v50 }
 0x19c   : > { %518 = vperm.xlu2 %870, %v504_v50   ;;  %v560_v52 = vpop.permute.xlu0 %559 }
 0x19d   : > { %572 = vmatpush.bf16.msra.mxu3 %v560_v52  ;;  %v509_v19 = vmul.f32 1.442695, %v506_v51  ;;  %v543_v52 = vld [vmem:[#allocation5 + $0x10] sm:$0xff] }
 0x1a4   : > { %393 = vperm.xlu2 %870, %v379_v44  }
 0x1e6   : > { %v389_v53 = vpop.permute.xlu2 %388 }
 0x1e7   : > { %v396_v61 = vsub.f32 %v1002_v18, %v389_v53 }
 0x1e9   : > { %v398_v63 = vmul.f32 1.442695, %v396_v61 }
 0x1ee   : > { %v514_v54 = vpop.permute.xlu2 %513 }
 0x1ef   : > { %v521_v55 = vsub.f32 %v492_v22, %v514_v54 }
 0x1f1   : > { %v523_v56 = vmul.f32 1.442695, %v521_v55 }
 0x1f3   : > { %875 = vpow2.f32 %v523_v56 }
 0x1f6   : > { %v519_v57 = vpop.permute.xlu2 %518 }
 0x1f7   : > { %v522_v58 = vsub.f32 %v493_v27, %v519_v57  ;;  %v417_v27 = vld [vmem:[#allocation5] sm:$0xff] }
 0x1f9   : > { %v876_v59 = vpop.eup %875  ;;  %v525_v60 = vmul.f32 1.442695, %v522_v58 }
 0x1fa   : > { %v532_v62 = vsel %vm371_vm4, %v876_v59, 0.0 }
 0x1fb   : > { %877 = vpow2.f32 %v525_v60  ;;  %533 = vadd.xlane.f32.xlu2 %v532_v62 }
 0x1fc   : > { %879 = vpow2.f32 %v398_v63 }
 0x1fe   : > { %v394_v0 = vpop.permute.xlu2 %393 }
 0x1ff   : > { %v397_v1 = vsub.f32 %v1006_v23, %v394_v0 }
 0x201   : > { %v878_v2 = vpop.eup %877  ;;  %v400_v3 = vmul.f32 1.442695, %v397_v1 }
 0x202   : > { %v557_v4 = vpack.c.bf16 %v878_v2, %v876_v59  ;;  %v880_v5 = vpop.eup %879  ;;  %v535_v11 = vsel %vm371_vm4, %v878_v2, 0.0 }
 0x203   : > { %881 = vpow2.f32 %v400_v3  ;;  %v406_v12 = vsel %vm371_vm4, %v880_v5, 0.0  ;;  %v544_v3 = vld [vmem:[#allocation5 + $0x18] sm:$0xff] }
 0x204   : > { %830 = vmatmul.msk.bf16.vlgmr.msra.gmra.mxu3 %vm371_vm4, %v557_v4  ;;  %883 = vpow2.f32 %v384_v6 }
 0x205   : > { %885 = vpow2.f32 %v507_v13 }
 0x206   : > { %887 = vpow2.f32 %v509_v19 }
 0x209   : > { %v882_v7 = vpop.eup %881  ;;  %v422_v28 = vpop.permute.xlu0 %421 }
 0x20a   : > { %v409_v8 = vsel %vm371_vm4, %v882_v7, 0.0  ;;  %v431_v9 = vpack.c.bf16 %v882_v7, %v880_v5  ;;  %v884_v10 = vpop.eup %883  ;;  %v429_v32 = vmul.f32 %v422_v28, %v417_v27 }
 0x20b   : > { %410 = vadd.xlane.f32.xlu1 %v409_v8  ;;  %v886_v14 = vpop.eup %885  ;;  %v405_v22 = vmul.f32 %v884_v10, %v403_v21 }
 0x20c   : > { %824 = vmatmul.msk.bf16.vlgmr.msra.gmra.mxu1 %vm371_vm4, %v431_v9  ;;  %v530_v16 = vmul.f32 %v886_v14, %v528_v15  ;;  %v888_v25 = vpop.eup %887 }
 0x20d   : > { %v531_v29 = vmul.f32 %v888_v25, %v529_v26 }
 0x213   : > { %536 = vadd.xlane.f32.xlu1 %v535_v11  ;;  %426 = vperm.xlu2 %870, %v884_v10  }
 0x21b   : > { %407 = vadd.xlane.f32.xlu1 %v406_v12 }
 0x26e   : > { %v534_v17 = vpop.xlane.xlu2 %533 }
 0x26f   : > { %v538_v18 = vadd.f32 %v534_v17, %v530_v16 }
 0x271   : > { %540 = vst.msk [vmem:[#allocation4 + $0x10] sm:$0xff] %vm283_vm2, %v538_v18 }
 0x276   : > { %v427_v38 = vpop.permute.xlu2 %426 }
 0x277   : > { %v430_v42 = vmul.f32 %v427_v38, %v418_v37 }
 0x278   : > { %v641_v20 = vld [vmem:[#allocation4 + $0x10] sm:$0xff] }
 0x279   : > { %645 = vperm.xlu0 %871, %v641_v20  }
 0x27e   : > { %v411_v23 = vpop.xlane.xlu1 %410 }
 0x27f   : > { %v413_v24 = vadd.f32 %v411_v23, %v405_v22 }
 0x281   : > { %416 = vst.msk [vmem:[#allocation4 + $0x8] sm:$0xff] %vm283_vm2, %v413_v24 }
 0x286   : > { %v537_v30 = vpop.xlane.xlu1 %536 }
 0x287   : > { %v539_v31 = vadd.f32 %v537_v30, %v531_v29  ;;  %v574_v54 = vpop.f32.mrf.mxu3 }
 0x288   : > { %v591_v33 = vld [vmem:[#allocation4 + $0x8] sm:$0xff] }
 0x289   : > { %541 = vst.msk [vmem:[#allocation4 + $0x18] sm:$0xff] %vm283_vm2, %v539_v31  ;;  %v444_v34 = vpop.f32.mrf.mxu1  ;;  %599 = vperm.xlu1 %872, %v591_v33  }
 0x28a   : > { %v449_v35 = vadd.f32 %v444_v34, %v429_v32 }
 0x28c   : > { %451 = vst.msk [vmem:[#allocation5] sm:$0xff] %vm292_vm1, %v449_v35 }
 0x28e   : > { %v408_v40 = vpop.xlane.xlu1 %407 }
 0x28f   : > { %v412_v41 = vadd.f32 %v408_v40, %v404_v39  ;;  %v576_v16 = vpop.f32.mrf.mxu3 }
 0x290   : > { %v642_v43 = vld [vmem:[#allocation4 + $0x18] sm:$0xff] }
 0x291   : > { %415 = vst.msk [vmem:[#allocation4] sm:$0xff] %vm283_vm2, %v412_v41  ;;  %v446_v44 = vpop.f32.mrf.mxu1  ;;  %650 = vperm.xlu0 %871, %v642_v43   ;;  %547 = vperm.xlu1 %872, %v886_v14  }
 0x292   : > { %v450_v45 = vadd.f32 %v446_v44, %v430_v42 }
 0x294   : > { %452 = vst.msk [vmem:[#allocation5 + $0x8] sm:$0xff] %vm292_vm1, %v450_v45  ;;  %v588_v45 = vld [vmem:[#allocation5] sm:$0xff] }
 0x298   : > { %v590_v46 = vld [vmem:[#allocation4] sm:$0xff] }
 0x299   : > { %552 = vperm.xlu0 %871, %v888_v25   ;;  %594 = vperm.xlu1 %872, %v590_v46  }
 0x29b   : > { %v589_v19 = vld [vmem:[#allocation5 + $0x8] sm:$0xff] }
 0x2eb   : > { %v646_v48 = vpop.permute.xlu0 %645 }
 0x2ec   : > { %889 = vrcp.f32 %v646_v48  ;;  %v664_v2 = vand.u32 2147483648, %v646_v48  ;;  %vm658_vm8 = vweird.f32 %v646_v48  ;;  %v662_v7 = vand.u32 2147483647, %v646_v48 }
 0x2ee   : > { %v665_v17 = vor.u32 1.1754944e-38, %v664_v2  ;;  %vm663_vm12 = vcmp.eq.f32.partialorder %v662_v7, 8.507059e+37 }
 0x2f2   : > { %v890_v49 = vpop.eup %889 }
 0x2f3   : > { %v654_v47 = vmul.f32 %v890_v49, %v646_v48  ;;  %vm659_vm6 = vweird.f32 %v890_v49 }
 0x2f4   : > { %vm1055_vm10 = vmor %vm658_vm8, %vm659_vm6  ;;  %vm637_vm6 = vcmask 130112   ;;  %vm693_vm8 = vcmask 261312  }
 0x2f5   : > { %v655_v51 = vsub.f32 1.0, %v654_v47 }
 0x2f7   : > { %v656_v58 = vmul.f32 %v890_v49, %v655_v51 }
 0x2f9   : > { %v657_v1 = vadd.f32 %v890_v49, %v656_v58 }
 0x2fb   : > { %v600_v50 = vpop.permute.xlu1 %599  ;;  %v661_v15 = vsel %vm1055_vm10, %v890_v49, %v657_v1 }
 0x2fc   : > { %891 = vrcp.f32 %v600_v50  ;;  %v628_v63 = vand.u32 2147483648, %v600_v50  ;;  %v626_v0 = vand.u32 2147483647, %v600_v50  ;;  %vm622_vm7 = vweird.f32 %v600_v50 }
 0x2fd   : > { %v666_v25 = vsel %vm663_vm12, %v665_v17, %v661_v15 }
 0x2fe   : > { %v629_v8 = vor.u32 1.1754944e-38, %v628_v63  ;;  %vm627_vm11 = vcmp.eq.f32.partialorder %v626_v0, 8.507059e+37 }
 0x302   : > { %v892_v53 = vpop.eup %891 }
 0x303   : > { %v618_v55 = vmul.f32 %v892_v53, %v600_v50  ;;  %v651_v56 = vpop.permute.xlu0 %650  ;;  %v548_v57 = vpop.permute.xlu1 %547  ;;  %vm623_vm5 = vweird.f32 %v892_v53 }
 0x304   : > { %893 = vrcp.f32 %v651_v56  ;;  %v555_v59 = vmul.f32 %v548_v57, %v543_v52  ;;  %vm1049_vm9 = vmor %vm622_vm7, %vm623_vm5  ;;  %v679_v27 = vand.u32 2147483648, %v651_v56  ;;  %vm673_vm14 = vweird.f32 %v651_v56 }
 0x305   : > { %v619_v60 = vsub.f32 1.0, %v618_v55  ;;  %v677_v30 = vand.u32 2147483647, %v651_v56  ;;  %vm687_vm7 = vcmask 195712  }
 0x306   : > { %v579_v61 = vadd.f32 %v574_v54, %v555_v59  ;;  %v680_v33 = vor.u32 1.1754944e-38, %v679_v27 }
 0x307   : > { %v620_v62 = vmul.f32 %v892_v53, %v619_v60  ;;  %vm678_vm0 = vcmp.eq.f32.partialorder %v677_v30, 8.507059e+37 }
 0x308   : > { %581 = vst.msk [vmem:[#allocation5 + $0x10] sm:$0xff] %vm292_vm1, %v579_v61 }
 0x309   : > { %v621_v4 = vadd.f32 %v892_v53, %v620_v62 }
 0x30a   : > { %v894_v5 = vpop.eup %893 }
 0x30b   : > { %v669_v9 = vmul.f32 %v894_v5, %v651_v56  ;;  %v553_v10 = vpop.permute.xlu0 %552  ;;  %v595_v11 = vpop.permute.xlu1 %594  ;;  %v625_v12 = vsel %vm1049_vm9, %v892_v53, %v621_v4  ;;  %vm674_vm13 = vweird.f32 %v894_v5 }
 0x30c   : > { %v556_v14 = vmul.f32 %v553_v10, %v544_v3  ;;  %895 = vrcp.f32 %v595_v11  ;;  %v630_v20 = vsel %vm627_vm11, %v629_v8, %v625_v12  ;;  %vm675_vm15 = vmor %vm673_vm14, %vm674_vm13  ;;  %v613_v35 = vand.u32 2147483648, %v595_v11 }
 0x30d   : > { %v670_v18 = vsub.f32 1.0, %v669_v9  ;;  %v631_v22 = vmul.f32 %v630_v20, %v589_v19  ;;  %v611_v37 = vand.u32 2147483647, %v595_v11  ;;  %vm607_vm3 = vweird.f32 %v595_v11 }
 0x30e   : > { %v580_v21 = vadd.f32 %v576_v16, %v556_v14  ;;  %v614_v42 = vor.u32 1.1754944e-38, %v613_v35 }
 0x30f   : > { %v671_v23 = vmul.f32 %v894_v5, %v670_v18  ;;  %v639_v24 = vld [vmem:[#allocation5 + $0x10] sm:$0xff]  ;;  %634 = vrot.lane.b32.xlu0 %v631_v22, %s927_s10  ;;  %vm612_vm5 = vcmp.eq.f32.partialorder %v611_v37, 8.507059e+37 }
 0x310   : > { %582 = vst.msk [vmem:[#allocation5 + $0x18] sm:$0xff] %vm292_vm1, %v580_v21  ;;  %v667_v26 = vmul.f32 %v666_v25, %v639_v24 }
 0x311   : > { %v672_v28 = vadd.f32 %v894_v5, %v671_v23 }
 0x312   : > { %v896_v29 = vpop.eup %895  ;;  %684 = vrot.lane.b32.xlu1 %v667_v26, %s928_s11 }
 0x313   : > { %v603_v31 = vmul.f32 %v896_v29, %v595_v11  ;;  %v676_v32 = vsel %vm675_vm15, %v894_v5, %v672_v28  ;;  %vm608_vm2 = vweird.f32 %v896_v29 }
 0x314   : > { %v681_v39 = vsel %vm678_vm0, %v680_v33, %v676_v32  ;;  %vm609_vm4 = vmor %vm607_vm3, %vm608_vm2 }
 0x315   : > { %v604_v34 = vsub.f32 1.0, %v603_v31 }
 0x317   : > { %v605_v36 = vmul.f32 %v896_v29, %v604_v34  ;;  %v640_v38 = vld [vmem:[#allocation5 + $0x18] sm:$0xff] }
 0x318   : > { %v682_v40 = vmul.f32 %v681_v39, %v640_v38 }
 0x319   : > { %v606_v41 = vadd.f32 %v896_v29, %v605_v36 }
 0x31a   : > { %690 = vrot.lane.b32.xlu0 %v682_v40, %s929_s12 }
 0x31b   : > { %v610_v43 = vsel %vm609_vm4, %v896_v29, %v606_v41 }
 0x31c   : > { %v615_v44 = vsel %vm612_vm5, %v614_v42, %v610_v43 }
 0x31d   : > { %v616_v46 = vmul.f32 %v615_v44, %v588_v45 }
 0x31f   : > { %632 = vst.msk [vmem:[%s277_s15] sm:$0xff] %vm292_vm1, %v616_v46 }
 0x381   : > { %v635_v48 = vpop.permute.xlu0 %634 }
 0x382   : > { %638 = vst.msk [vmem:[%s277_s15] sm:$0xff] %vm637_vm6, %v635_v48 }
 0x384   : > { %v685_v49 = vpop.permute.xlu1 %684 }
 0x385   : > { %688 = vst.msk [vmem:[%s277_s15] sm:$0xff] %vm687_vm7, %v685_v49 }
 0x38c   : > { %v691_v50 = vpop.permute.xlu0 %690 }
 0x38d   : > { %694 = vst.msk [vmem:[%s277_s15] sm:$0xff] %vm693_vm8, %v691_v50 }
 0x38e PF: > { %s15_s19 = sadd.s32 1, %s919_s19   ;;  %s1086_s17 = smov %s915_s18 }
 0x38f   : > { %p12_p6 = scmp.ge.s32.totalorder %s15_s19, 4   ;;  %s1087_s18 = smov %s1089_s0 }
 0x391   :  { %14 = sbr.rel (!%p12_p6) target bundleno = 2 (0x2), region = 81 }

</bundles_post_ra>
